<compile_context>
chip_gen: v7x
topology: tpu7x:2x2x1
jax: 0.10.0
libtpu: 0.0.40
codegen_flags: <defaults>
</compile_context>

<pallas_src>
import functools

import jax
import jax.numpy as jnp
from jax.experimental import pallas as pl
from jax.experimental.pallas import tpu as pltpu

EPS = 1e-5
F_IN = 3 * 66          # 198
W1_ROWS = 208          # 198 padded up to a bf16 sublane-tile multiple (16)
F_IN_PAD = 256         # lane-aligned K for the first matmul

# Row layout of the fused w2|w3|w4 HBM buffer (lane width 256, exact packing, no waste):
W2A_LO, W2A_HI = 0, 512        # w2[:, 0:256]
W2B_LO, W2B_HI = 512, 1024     # w2[:, 256:512]
W3_LO, W3_HI = 1024, 1536      # w3 (512, 256)
W4_LO, W4_HI = 1536, 1792      # w4 (256, 256)
WB_ROWS = 1792


def _bn_relu_fold(h, gamma, beta, num_groups, out_dtype):
    """Training-mode BatchNorm1d (biased batch variance) + affine + ReLU, folded,
    with statistics computed independently per sub-batch (group).

    h: (B, F) float32, B = num_groups * group_size.  gamma/beta: (1, F) float32.
    Single fused pass over the batch axis: s1 = sum(h), s2 = sum(h*h),
    var = s2/N - mean^2 (clamped >= 0 to guard cancellation).
    """
    b, f = h.shape
    gs = b // num_groups
    inv_n = 1.0 / float(gs)
    hg = h.reshape(num_groups, gs, f)              # split at sublane-aligned boundaries
    s1 = jnp.sum(hg, axis=1)                       # (G, F)
    s2 = jnp.sum(hg * hg, axis=1)                  # (G, F)  (reuses the h*h product)
    mean = s1 * inv_n
    var = jnp.maximum(s2 * inv_n - mean * mean, 0.0)
    scale = gamma * jax.lax.rsqrt(var + EPS)       # (G, F)
    shift = beta - mean * scale                    # (G, F)
    out = jnp.maximum(hg * scale[:, None, :] + shift[:, None, :], 0.0)
    return out.reshape(b, f).astype(out_dtype)


def disc_kernel(
    x_ref,                 # (B, 256) bf16, VMEM
    p_ref,                 # (10, 512) f32, VMEM (gamma/beta x4, w5^T, b5)
    w1_hbm,                # (208, 512) bf16, HBM (pl.ANY)
    wb_hbm,                # (1792, 256) bf16, HBM (pl.ANY): packed w2|w3|w4
    out_ref,               # (B, 1) f32, VMEM
    w1_v,                  # (256, 512) bf16 VMEM scratch
    wb_v,                  # (1792, 256) bf16 VMEM scratch
    sem,                   # DMA semaphores, shape (2,)
    *,
    num_groups,
):
    # Two DMA descriptors total: w1 alone (layer 1 starts ASAP), the rest fused.
    c1 = pltpu.make_async_copy(w1_hbm, w1_v.at[0:W1_ROWS, :], sem.at[0])
    cb = pltpu.make_async_copy(wb_hbm, wb_v, sem.at[1])
    c1.start()
    cb.start()

    # Zero the 48 pad rows of w1's scratch (disjoint from the in-flight DMA region),
    # so the K=256 matmul sees zeros instead of stale VMEM.
    w1_v[W1_ROWS:F_IN_PAD, :] = jnp.zeros((F_IN_PAD - W1_ROWS, 512), jnp.bfloat16)

    x = x_ref[...]                                            # (B, 256) bf16

    # Layer 1: Linear(198->512, K zero-padded to 256) + BN + ReLU
    c1.wait()
    h = jnp.dot(x, w1_v[...], preferred_element_type=jnp.float32)
    h = _bn_relu_fold(h, p_ref[0:1, :], p_ref[1:2, :], num_groups, jnp.bfloat16)

    # Layer 2: Linear(512->512) + BN + ReLU  (two N=256 matmuls over the packed halves)
    cb.wait()
    h2a = jnp.dot(h, wb_v[W2A_LO:W2A_HI, :], preferred_element_type=jnp.float32)
    h2b = jnp.dot(h, wb_v[W2B_LO:W2B_HI, :], preferred_element_type=jnp.float32)
    h = jnp.concatenate([h2a, h2b], axis=1)                   # (B, 512) f32
    h = _bn_relu_fold(h, p_ref[2:3, :], p_ref[3:4, :], num_groups, jnp.bfloat16)

    # Layer 3: Linear(512->256) + BN + ReLU
    h = jnp.dot(h, wb_v[W3_LO:W3_HI, :], preferred_element_type=jnp.float32)
    h = _bn_relu_fold(h, p_ref[4:5, :256], p_ref[5:6, :256], num_groups, jnp.bfloat16)

    # Layer 4: Linear(256->256) + BN + ReLU (f32 for the VPU final layer)
    h = jnp.dot(h, wb_v[W4_LO:W4_HI, :], preferred_element_type=jnp.float32)
    h = _bn_relu_fold(h, p_ref[6:7, :256], p_ref[7:8, :256], num_groups, jnp.float32)

    # Layer 5: Linear(256->1) as VPU multiply + lane reduction (skip MXU for N=1).
    w5 = p_ref[8:9, :256]                                     # (1, 256) f32
    b5 = p_ref[9:10, 0:1]                                     # (1, 1) f32
    out = jnp.sum(h * w5, axis=-1, keepdims=True) + b5
    out_ref[...] = out.astype(out_ref.dtype)


def init_params(key):
    """Deterministic params matching the PyTorch module's parameter set.

    Linear weights stored as (in_features, out_features) so the kernel does x @ W.
    b1..b4 are created for parity with PyTorch but are NOT used by the kernel:
    a constant pre-BN bias is exactly removed by training-mode BatchNorm's
    batch-mean subtraction.
    """
    dims = [(F_IN, 512), (512, 512), (512, 256), (256, 256), (256, 1)]
    params = {}
    for i, (fin, fout) in enumerate(dims, start=1):
        key, kw, kb = jax.random.split(key, 3)
        bound = 1.0 / float(fin) ** 0.5
        params[f"w{i}"] = jax.random.uniform(kw, (fin, fout), jnp.float32, -bound, bound)
        params[f"b{i}"] = jax.random.uniform(kb, (fout,), jnp.float32, -bound, bound)
        if i <= 4:  # BatchNorm1d after the first four linears
            params[f"g{i}"] = jnp.ones((fout,), jnp.float32)
            params[f"beta{i}"] = jnp.zeros((fout,), jnp.float32)
    return params


def pack_params(p):
    """bf16 weights packed for two DMA descriptors, plus one (10, 512) f32 array
    for all per-feature vectors: [g1, be1, g2, be2, g3, be3, g4, be4, w5^T, b5]."""
    # w1: pad 198 -> 208 rows only (bf16 sublane multiple); kernel zero-fills 208..255.
    w1 = jnp.pad(p["w1"], ((0, W1_ROWS - F_IN), (0, 0))).astype(jnp.bfloat16)
    w2 = p["w2"].astype(jnp.bfloat16)
    w3 = p["w3"].astype(jnp.bfloat16)
    w4 = p["w4"].astype(jnp.bfloat16)
    # Exact packing at lane width 256: [w2 left half ; w2 right half ; w3 ; w4]
    wb = jnp.concatenate([w2[:, :256], w2[:, 256:], w3, w4], axis=0)   # (1792, 256)

    def row(v):
        v = v.reshape(-1).astype(jnp.float32)
        return jnp.pad(v, (0, 512 - v.shape[0]))

    packed = jnp.stack([
        row(p["g1"]), row(p["beta1"]),
        row(p["g2"]), row(p["beta2"]),
        row(p["g3"]), row(p["beta3"]),
        row(p["g4"]), row(p["beta4"]),
        row(p["w5"][:, 0]),     # final weight as a 256-wide row
        row(p["b5"]),           # final bias at column 0
    ])
    # b1..b4 intentionally omitted (exactly cancelled by training-mode BN).
    return w1, wb, packed


def discriminator_forward(x, params, num_groups=1):
    """Runs the discriminator on x.view(-1, 198).

    num_groups > 1 runs several sub-batches (e.g. real|fake concatenated on the batch
    axis) through ONE kernel call, amortizing the weight DMA, while BatchNorm stats are
    computed per sub-batch so each group sees exactly the original module's semantics.
    """
    x_flat = x.reshape(-1, F_IN).astype(jnp.float32)
    B = x_flat.shape[0]
    assert B % num_groups == 0, "batch must divide evenly into groups"
    if num_groups > 1:
        assert (B // num_groups) % 8 == 0, "per-group rows should be sublane-aligned"
    x_pad = jnp.pad(x_flat, ((0, 0), (0, F_IN_PAD - F_IN))).astype(jnp.bfloat16)

    w1, wb, packed = pack_params(params)

    vmem = pl.BlockSpec(memory_space=pltpu.MemorySpace.VMEM)
    hbm = pl.BlockSpec(memory_space=pl.ANY)

    cost = pl.CostEstimate(
        flops=2 * B * (F_IN_PAD * 512 + 512 * 512 + 512 * 256 + 256 * 256 + 256),
        transcendentals=num_groups * (512 + 512 + 256 + 256),   # rsqrt per feature/group
        bytes_accessed=(W1_ROWS * 512 + WB_ROWS * 256) * 2      # bf16 weights
        + 10 * 512 * 4                                          # packed per-feature f32
        + B * F_IN_PAD * 2 + B * 4,                             # input + output
    )

    return pl.pallas_call(
        functools.partial(disc_kernel, num_groups=num_groups),
        out_shape=jax.ShapeDtypeStruct((B, 1), jnp.float32),
        in_specs=[vmem, vmem, hbm, hbm],
        out_specs=vmem,
        scratch_shapes=[
            pltpu.VMEM((F_IN_PAD, 512), jnp.bfloat16),   # w1 (padded rows zeroed in-kernel)
            pltpu.VMEM((WB_ROWS, 256), jnp.bfloat16),    # packed w2|w3|w4
            pltpu.SemaphoreType.DMA((2,)),
        ],
        cost_estimate=cost,
    )(x_pad, packed, w1, wb)


def reference_forward(x, params):
    """Pure-JAX f32 reference of the PyTorch module (training-mode BN, biases included),
    with x and w1..w4 quantized to bf16 to match the kernel's storage dtypes."""
    def q(w):
        return w.astype(jnp.bfloat16).astype(jnp.float32)

    h = x.reshape(-1, F_IN).astype(jnp.bfloat16).astype(jnp.float32)
    for i in range(1, 5):
        h = h @ q(params[f"w{i}"]) + params[f"b{i}"]
        mean = jnp.mean(h, axis=0, keepdims=True)
        var = jnp.var(h, axis=0, keepdims=True)
        h = (h - mean) * jax.lax.rsqrt(var + EPS)
        h = h * params[f"g{i}"] + params[f"beta{i}"]
        h = jnp.maximum(h, 0.0)
    return h @ params["w5"] + params["b5"]


if __name__ == "__main__":
    key = jax.random.PRNGKey(0)
    key, k_real, k_fake = jax.random.split(key, 3)

    B = 8  # BatchNorm1d (training semantics) needs batch > 1; 8 is sublane-aligned
    x_real = jax.random.normal(k_real, (B, 3, 66), jnp.float32)
    x_fake = jax.random.normal(k_fake, (B, 3, 66), jnp.float32)

    params = init_params(key)

    # 1) Plain single-batch call: exact module semantics.
    out = jax.block_until_ready(discriminator_forward(x_real, params))
    assert out.shape == (B, 1), out.shape
    assert out.dtype == jnp.float32, out.dtype
    assert bool(jnp.all(jnp.isfinite(out)))
    ref = reference_forward(x_real, params)
    assert float(jnp.max(jnp.abs(out - ref))) < 1e-1, "mismatch vs f32 reference"

    # 2) Fused real+fake call: one weight DMA amortized over 2x rows, BN stats
    #    computed per sub-batch inside the kernel (GAN semantics preserved).
    x_both = jnp.concatenate([x_real, x_fake], axis=0)            # (2B, 3, 66)
    out_both = jax.block_until_ready(
        discriminator_forward(x_both, params, num_groups=2))
    ref_both = jnp.concatenate(
        [reference_forward(x_real, params), reference_forward(x_fake, params)], axis=0)
    assert out_both.shape == (2 * B, 1), out_both.shape
    assert bool(jnp.all(jnp.isfinite(out_both)))
    assert float(jnp.max(jnp.abs(out_both - ref_both))) < 1e-1, "mismatch in fused call"

    print("KERNEL_OK")
</pallas_src>

<mosaic_0001>
module attributes {stable_mosaic.version = 11 : i64} {
  func.func @disc_kernel(%arg0: memref<8x256xbf16, #tpu.memory_space<vmem>>, %arg1: memref<10x512xf32, #tpu.memory_space<vmem>>, %arg2: memref<208x512xbf16, #tpu.memory_space<any>>, %arg3: memref<1792x256xbf16, #tpu.memory_space<any>>, %arg4: memref<8x1xf32, #tpu.memory_space<vmem>>, %arg5: memref<256x512xbf16, #tpu.memory_space<vmem>>, %arg6: memref<1792x256xbf16, #tpu.memory_space<vmem>>, %arg7: memref<2x!tpu.dma_semaphore, #tpu.memory_space<semaphore_mem>>) attributes {dimension_semantics = [], scalar_prefetch = 0 : i64, scratch_operands = 3 : i64, tpu.core_type = #tpu.core_type<tc>} {
    %c0_i32 = arith.constant 0 : i32
    %c0_i32_0 = arith.constant 0 : i32
    %c0_i32_1 = arith.constant 0 : i32
    %0 = tpu.memref_slice %arg5[%c0_i32_0, %c0_i32_1] : memref<256x512xbf16, #tpu.memory_space<vmem>> -> memref<208x512xbf16, #tpu.memory_space<vmem>>
    %1 = tpu.memref_slice %arg7[%c0_i32] : memref<2x!tpu.dma_semaphore, #tpu.memory_space<semaphore_mem>> -> memref<1x!tpu.dma_semaphore, #tpu.memory_space<semaphore_mem>>
    %2 = tpu.memref_squeeze %1 : memref<1x!tpu.dma_semaphore, #tpu.memory_space<semaphore_mem>> -> memref<!tpu.dma_semaphore, #tpu.memory_space<semaphore_mem>>
    tpu.enqueue_dma source(%arg2 : memref<208x512xbf16, #tpu.memory_space<any>>) target(%0 : memref<208x512xbf16, #tpu.memory_space<vmem>>) target_semaphore(%2 : memref<!tpu.dma_semaphore, #tpu.memory_space<semaphore_mem>>)
    %c1_i32 = arith.constant 1 : i32
    %3 = tpu.memref_slice %arg7[%c1_i32] : memref<2x!tpu.dma_semaphore, #tpu.memory_space<semaphore_mem>> -> memref<1x!tpu.dma_semaphore, #tpu.memory_space<semaphore_mem>>
    %4 = tpu.memref_squeeze %3 : memref<1x!tpu.dma_semaphore, #tpu.memory_space<semaphore_mem>> -> memref<!tpu.dma_semaphore, #tpu.memory_space<semaphore_mem>>
    tpu.enqueue_dma source(%arg3 : memref<1792x256xbf16, #tpu.memory_space<any>>) target(%arg6 : memref<1792x256xbf16, #tpu.memory_space<vmem>>) target_semaphore(%4 : memref<!tpu.dma_semaphore, #tpu.memory_space<semaphore_mem>>)
    %cst = arith.constant 0.000000e+00 : bf16
    %5 = vector.broadcast %cst : bf16 to vector<48x512xbf16>
    %c208 = arith.constant 208 : index
    %c0 = arith.constant 0 : index
    %6 = vector.load %arg5[%c208, %c0] : memref<256x512xbf16, #tpu.memory_space<vmem>>, vector<48x512xbf16>
    tpu.vector_store %arg5[%c208, %c0], %5 {strides = array<i32>} : memref<256x512xbf16, #tpu.memory_space<vmem>>, vector<48x512xbf16>,
    %c0_2 = arith.constant 0 : index
    %c0_3 = arith.constant 0 : index
    %7 = vector.load %arg0[%c0_2, %c0_3] : memref<8x256xbf16, #tpu.memory_space<vmem>>, vector<8x256xbf16>
    %c0_i32_4 = arith.constant 0 : i32
    %c0_i32_5 = arith.constant 0 : i32
    %c0_i32_6 = arith.constant 0 : i32
    %8 = tpu.memref_slice %arg5[%c0_i32_5, %c0_i32_6] : memref<256x512xbf16, #tpu.memory_space<vmem>> -> memref<208x512xbf16, #tpu.memory_space<vmem>>
    %9 = tpu.memref_slice %arg7[%c0_i32_4] : memref<2x!tpu.dma_semaphore, #tpu.memory_space<semaphore_mem>> -> memref<1x!tpu.dma_semaphore, #tpu.memory_space<semaphore_mem>>
    %10 = tpu.memref_squeeze %9 : memref<1x!tpu.dma_semaphore, #tpu.memory_space<semaphore_mem>> -> memref<!tpu.dma_semaphore, #tpu.memory_space<semaphore_mem>>
    tpu.wait_dma2 semaphore(%10 : memref<!tpu.dma_semaphore, #tpu.memory_space<semaphore_mem>>) src(%arg2 : memref<208x512xbf16, #tpu.memory_space<any>>) dst(%8 : memref<208x512xbf16, #tpu.memory_space<vmem>>)
    %c0_7 = arith.constant 0 : index
    %c0_8 = arith.constant 0 : index
    %11 = vector.load %arg5[%c0_7, %c0_8] : memref<256x512xbf16, #tpu.memory_space<vmem>>, vector<256x512xbf16>
    %cst_9 = arith.constant dense<0.000000e+00> : vector<8x512xf32>
    %12 = tpu.matmul %7, %11, %cst_9 {dimension_numbers = #tpu.dot_dimension_numbers<[1], [0], [0], [1], [0, 0, 1, 1], [], []>} : vector<8x256xbf16>, vector<256x512xbf16>, vector<8x512xf32> -> vector<8x512xf32>
    %c0_10 = arith.constant 0 : index
    %c0_11 = arith.constant 0 : index
    %13 = vector.load %arg1[%c0_10, %c0_11] : memref<10x512xf32, #tpu.memory_space<vmem>>, vector<1x512xf32>
    %c1 = arith.constant 1 : index
    %c0_12 = arith.constant 0 : index
    %14 = vector.load %arg1[%c1, %c0_12] : memref<10x512xf32, #tpu.memory_space<vmem>>, vector<1x512xf32>
    %15 = vector.shape_cast %12 : vector<8x512xf32> to vector<1x8x512xf32>
    %cst_13 = arith.constant dense<0.000000e+00> : vector<1x512xf32>
    %16 = vector.multi_reduction <add>, %15, %cst_13 [1] : vector<1x8x512xf32> to vector<1x512xf32>
    %17 = arith.mulf %15, %15 : vector<1x8x512xf32>
    %cst_14 = arith.constant dense<0.000000e+00> : vector<1x512xf32>
    %18 = vector.multi_reduction <add>, %17, %cst_14 [1] : vector<1x8x512xf32> to vector<1x512xf32>
    %cst_15 = arith.constant 1.250000e-01 : f32
    %19 = vector.broadcast %cst_15 : f32 to vector<1x512xf32>
    %20 = arith.mulf %16, %19 : vector<1x512xf32>
    %cst_16 = arith.constant 1.250000e-01 : f32
    %21 = vector.broadcast %cst_16 : f32 to vector<1x512xf32>
    %22 = arith.mulf %18, %21 : vector<1x512xf32>
    %23 = arith.mulf %20, %20 : vector<1x512xf32>
    %24 = arith.subf %22, %23 : vector<1x512xf32>
    %cst_17 = arith.constant 0.000000e+00 : f32
    %25 = vector.broadcast %cst_17 : f32 to vector<1x512xf32>
    %26 = arith.maximumf %24, %25 : vector<1x512xf32>
    %cst_18 = arith.constant 9.99999974E-6 : f32
    %27 = vector.broadcast %cst_18 : f32 to vector<1x512xf32>
    %28 = arith.addf %26, %27 : vector<1x512xf32>
    %29 = math.rsqrt %28 : vector<1x512xf32>
    %30 = arith.mulf %13, %29 : vector<1x512xf32>
    %31 = arith.mulf %20, %30 : vector<1x512xf32>
    %32 = arith.subf %14, %31 : vector<1x512xf32>
    %33 = vector.shape_cast %30 : vector<1x512xf32> to vector<1x1x512xf32>
    %34 = vector.broadcast %33 : vector<1x1x512xf32> to vector<1x8x512xf32>
    %35 = arith.mulf %15, %34 : vector<1x8x512xf32>
    %36 = vector.shape_cast %32 : vector<1x512xf32> to vector<1x1x512xf32>
    %37 = vector.broadcast %36 : vector<1x1x512xf32> to vector<1x8x512xf32>
    %38 = arith.addf %35, %37 : vector<1x8x512xf32>
    %cst_19 = arith.constant 0.000000e+00 : f32
    %39 = vector.broadcast %cst_19 : f32 to vector<1x8x512xf32>
    %40 = arith.maximumf %38, %39 : vector<1x8x512xf32>
    %41 = vector.shape_cast %40 : vector<1x8x512xf32> to vector<8x512xf32>
    %42 = arith.truncf %41 : vector<8x512xf32> to vector<8x512xbf16>
    %c1_i32_20 = arith.constant 1 : i32
    %43 = tpu.memref_slice %arg7[%c1_i32_20] : memref<2x!tpu.dma_semaphore, #tpu.memory_space<semaphore_mem>> -> memref<1x!tpu.dma_semaphore, #tpu.memory_space<semaphore_mem>>
    %44 = tpu.memref_squeeze %43 : memref<1x!tpu.dma_semaphore, #tpu.memory_space<semaphore_mem>> -> memref<!tpu.dma_semaphore, #tpu.memory_space<semaphore_mem>>
    tpu.wait_dma2 semaphore(%44 : memref<!tpu.dma_semaphore, #tpu.memory_space<semaphore_mem>>) src(%arg3 : memref<1792x256xbf16, #tpu.memory_space<any>>) dst(%arg6 : memref<1792x256xbf16, #tpu.memory_space<vmem>>)
    %c0_21 = arith.constant 0 : index
    %c0_22 = arith.constant 0 : index
    %45 = vector.load %arg6[%c0_21, %c0_22] : memref<1792x256xbf16, #tpu.memory_space<vmem>>, vector<512x256xbf16>
    %cst_23 = arith.constant dense<0.000000e+00> : vector<8x256xf32>
    %46 = tpu.matmul %42, %45, %cst_23 {dimension_numbers = #tpu.dot_dimension_numbers<[1], [0], [0], [1], [0, 0, 1, 1], [], []>} : vector<8x512xbf16>, vector<512x256xbf16>, vector<8x256xf32> -> vector<8x256xf32>
    %c512 = arith.constant 512 : index
    %c0_24 = arith.constant 0 : index
    %47 = vector.load %arg6[%c512, %c0_24] : memref<1792x256xbf16, #tpu.memory_space<vmem>>, vector<512x256xbf16>
    %cst_25 = arith.constant dense<0.000000e+00> : vector<8x256xf32>
    %48 = tpu.matmul %42, %47, %cst_25 {dimension_numbers = #tpu.dot_dimension_numbers<[1], [0], [0], [1], [0, 0, 1, 1], [], []>} : vector<8x512xbf16>, vector<512x256xbf16>, vector<8x256xf32> -> vector<8x256xf32>
    %49 = tpu.concatenate %46, %48 in 1 : vector<8x256xf32>, vector<8x256xf32> -> vector<8x512xf32>
    %c2 = arith.constant 2 : index
    %c0_26 = arith.constant 0 : index
    %50 = vector.load %arg1[%c2, %c0_26] : memref<10x512xf32, #tpu.memory_space<vmem>>, vector<1x512xf32>
    %c3 = arith.constant 3 : index
    %c0_27 = arith.constant 0 : index
    %51 = vector.load %arg1[%c3, %c0_27] : memref<10x512xf32, #tpu.memory_space<vmem>>, vector<1x512xf32>
    %52 = vector.shape_cast %49 : vector<8x512xf32> to vector<1x8x512xf32>
    %cst_28 = arith.constant dense<0.000000e+00> : vector<1x512xf32>
    %53 = vector.multi_reduction <add>, %52, %cst_28 [1] : vector<1x8x512xf32> to vector<1x512xf32>
    %54 = arith.mulf %52, %52 : vector<1x8x512xf32>
    %cst_29 = arith.constant dense<0.000000e+00> : vector<1x512xf32>
    %55 = vector.multi_reduction <add>, %54, %cst_29 [1] : vector<1x8x512xf32> to vector<1x512xf32>
    %cst_30 = arith.constant 1.250000e-01 : f32
    %56 = vector.broadcast %cst_30 : f32 to vector<1x512xf32>
    %57 = arith.mulf %53, %56 : vector<1x512xf32>
    %cst_31 = arith.constant 1.250000e-01 : f32
    %58 = vector.broadcast %cst_31 : f32 to vector<1x512xf32>
    %59 = arith.mulf %55, %58 : vector<1x512xf32>
    %60 = arith.mulf %57, %57 : vector<1x512xf32>
    %61 = arith.subf %59, %60 : vector<1x512xf32>
    %cst_32 = arith.constant 0.000000e+00 : f32
    %62 = vector.broadcast %cst_32 : f32 to vector<1x512xf32>
    %63 = arith.maximumf %61, %62 : vector<1x512xf32>
    %cst_33 = arith.constant 9.99999974E-6 : f32
    %64 = vector.broadcast %cst_33 : f32 to vector<1x512xf32>
    %65 = arith.addf %63, %64 : vector<1x512xf32>
    %66 = math.rsqrt %65 : vector<1x512xf32>
    %67 = arith.mulf %50, %66 : vector<1x512xf32>
    %68 = arith.mulf %57, %67 : vector<1x512xf32>
    %69 = arith.subf %51, %68 : vector<1x512xf32>
    %70 = vector.shape_cast %67 : vector<1x512xf32> to vector<1x1x512xf32>
    %71 = vector.broadcast %70 : vector<1x1x512xf32> to vector<1x8x512xf32>
    %72 = arith.mulf %52, %71 : vector<1x8x512xf32>
    %73 = vector.shape_cast %69 : vector<1x512xf32> to vector<1x1x512xf32>
    %74 = vector.broadcast %73 : vector<1x1x512xf32> to vector<1x8x512xf32>
    %75 = arith.addf %72, %74 : vector<1x8x512xf32>
    %cst_34 = arith.constant 0.000000e+00 : f32
    %76 = vector.broadcast %cst_34 : f32 to vector<1x8x512xf32>
    %77 = arith.maximumf %75, %76 : vector<1x8x512xf32>
    %78 = vector.shape_cast %77 : vector<1x8x512xf32> to vector<8x512xf32>
    %79 = arith.truncf %78 : vector<8x512xf32> to vector<8x512xbf16>
    %c1024 = arith.constant 1024 : index
    %c0_35 = arith.constant 0 : index
    %80 = vector.load %arg6[%c1024, %c0_35] : memref<1792x256xbf16, #tpu.memory_space<vmem>>, vector<512x256xbf16>
    %cst_36 = arith.constant dense<0.000000e+00> : vector<8x256xf32>
    %81 = tpu.matmul %79, %80, %cst_36 {dimension_numbers = #tpu.dot_dimension_numbers<[1], [0], [0], [1], [0, 0, 1, 1], [], []>} : vector<8x512xbf16>, vector<512x256xbf16>, vector<8x256xf32> -> vector<8x256xf32>
    %c4 = arith.constant 4 : index
    %c0_37 = arith.constant 0 : index
    %82 = vector.load %arg1[%c4, %c0_37] : memref<10x512xf32, #tpu.memory_space<vmem>>, vector<1x256xf32>
    %c5 = arith.constant 5 : index
    %c0_38 = arith.constant 0 : index
    %83 = vector.load %arg1[%c5, %c0_38] : memref<10x512xf32, #tpu.memory_space<vmem>>, vector<1x256xf32>
    %84 = vector.shape_cast %81 : vector<8x256xf32> to vector<1x8x256xf32>
    %cst_39 = arith.constant dense<0.000000e+00> : vector<1x256xf32>
    %85 = vector.multi_reduction <add>, %84, %cst_39 [1] : vector<1x8x256xf32> to vector<1x256xf32>
    %86 = arith.mulf %84, %84 : vector<1x8x256xf32>
    %cst_40 = arith.constant dense<0.000000e+00> : vector<1x256xf32>
    %87 = vector.multi_reduction <add>, %86, %cst_40 [1] : vector<1x8x256xf32> to vector<1x256xf32>
    %cst_41 = arith.constant 1.250000e-01 : f32
    %88 = vector.broadcast %cst_41 : f32 to vector<1x256xf32>
    %89 = arith.mulf %85, %88 : vector<1x256xf32>
    %cst_42 = arith.constant 1.250000e-01 : f32
    %90 = vector.broadcast %cst_42 : f32 to vector<1x256xf32>
    %91 = arith.mulf %87, %90 : vector<1x256xf32>
    %92 = arith.mulf %89, %89 : vector<1x256xf32>
    %93 = arith.subf %91, %92 : vector<1x256xf32>
    %cst_43 = arith.constant 0.000000e+00 : f32
    %94 = vector.broadcast %cst_43 : f32 to vector<1x256xf32>
    %95 = arith.maximumf %93, %94 : vector<1x256xf32>
    %cst_44 = arith.constant 9.99999974E-6 : f32
    %96 = vector.broadcast %cst_44 : f32 to vector<1x256xf32>
    %97 = arith.addf %95, %96 : vector<1x256xf32>
    %98 = math.rsqrt %97 : vector<1x256xf32>
    %99 = arith.mulf %82, %98 : vector<1x256xf32>
    %100 = arith.mulf %89, %99 : vector<1x256xf32>
    %101 = arith.subf %83, %100 : vector<1x256xf32>
    %102 = vector.shape_cast %99 : vector<1x256xf32> to vector<1x1x256xf32>
    %103 = vector.broadcast %102 : vector<1x1x256xf32> to vector<1x8x256xf32>
    %104 = arith.mulf %84, %103 : vector<1x8x256xf32>
    %105 = vector.shape_cast %101 : vector<1x256xf32> to vector<1x1x256xf32>
    %106 = vector.broadcast %105 : vector<1x1x256xf32> to vector<1x8x256xf32>
    %107 = arith.addf %104, %106 : vector<1x8x256xf32>
    %cst_45 = arith.constant 0.000000e+00 : f32
    %108 = vector.broadcast %cst_45 : f32 to vector<1x8x256xf32>
    %109 = arith.maximumf %107, %108 : vector<1x8x256xf32>
    %110 = vector.shape_cast %109 : vector<1x8x256xf32> to vector<8x256xf32>
    %111 = arith.truncf %110 : vector<8x256xf32> to vector<8x256xbf16>
    %c1536 = arith.constant 1536 : index
    %c0_46 = arith.constant 0 : index
    %112 = vector.load %arg6[%c1536, %c0_46] : memref<1792x256xbf16, #tpu.memory_space<vmem>>, vector<256x256xbf16>
    %cst_47 = arith.constant dense<0.000000e+00> : vector<8x256xf32>
    %113 = tpu.matmul %111, %112, %cst_47 {dimension_numbers = #tpu.dot_dimension_numbers<[1], [0], [0], [1], [0, 0, 1, 1], [], []>} : vector<8x256xbf16>, vector<256x256xbf16>, vector<8x256xf32> -> vector<8x256xf32>
    %c6 = arith.constant 6 : index
    %c0_48 = arith.constant 0 : index
    %114 = vector.load %arg1[%c6, %c0_48] : memref<10x512xf32, #tpu.memory_space<vmem>>, vector<1x256xf32>
    %c7 = arith.constant 7 : index
    %c0_49 = arith.constant 0 : index
    %115 = vector.load %arg1[%c7, %c0_49] : memref<10x512xf32, #tpu.memory_space<vmem>>, vector<1x256xf32>
    %116 = vector.shape_cast %113 : vector<8x256xf32> to vector<1x8x256xf32>
    %cst_50 = arith.constant dense<0.000000e+00> : vector<1x256xf32>
    %117 = vector.multi_reduction <add>, %116, %cst_50 [1] : vector<1x8x256xf32> to vector<1x256xf32>
    %118 = arith.mulf %116, %116 : vector<1x8x256xf32>
    %cst_51 = arith.constant dense<0.000000e+00> : vector<1x256xf32>
    %119 = vector.multi_reduction <add>, %118, %cst_51 [1] : vector<1x8x256xf32> to vector<1x256xf32>
    %cst_52 = arith.constant 1.250000e-01 : f32
    %120 = vector.broadcast %cst_52 : f32 to vector<1x256xf32>
    %121 = arith.mulf %117, %120 : vector<1x256xf32>
    %cst_53 = arith.constant 1.250000e-01 : f32
    %122 = vector.broadcast %cst_53 : f32 to vector<1x256xf32>
    %123 = arith.mulf %119, %122 : vector<1x256xf32>
    %124 = arith.mulf %121, %121 : vector<1x256xf32>
    %125 = arith.subf %123, %124 : vector<1x256xf32>
    %cst_54 = arith.constant 0.000000e+00 : f32
    %126 = vector.broadcast %cst_54 : f32 to vector<1x256xf32>
    %127 = arith.maximumf %125, %126 : vector<1x256xf32>
    %cst_55 = arith.constant 9.99999974E-6 : f32
    %128 = vector.broadcast %cst_55 : f32 to vector<1x256xf32>
    %129 = arith.addf %127, %128 : vector<1x256xf32>
    %130 = math.rsqrt %129 : vector<1x256xf32>
    %131 = arith.mulf %114, %130 : vector<1x256xf32>
    %132 = arith.mulf %121, %131 : vector<1x256xf32>
    %133 = arith.subf %115, %132 : vector<1x256xf32>
    %134 = vector.shape_cast %131 : vector<1x256xf32> to vector<1x1x256xf32>
    %135 = vector.broadcast %134 : vector<1x1x256xf32> to vector<1x8x256xf32>
    %136 = arith.mulf %116, %135 : vector<1x8x256xf32>
    %137 = vector.shape_cast %133 : vector<1x256xf32> to vector<1x1x256xf32>
    %138 = vector.broadcast %137 : vector<1x1x256xf32> to vector<1x8x256xf32>
    %139 = arith.addf %136, %138 : vector<1x8x256xf32>
    %cst_56 = arith.constant 0.000000e+00 : f32
    %140 = vector.broadcast %cst_56 : f32 to vector<1x8x256xf32>
    %141 = arith.maximumf %139, %140 : vector<1x8x256xf32>
    %142 = vector.shape_cast %141 : vector<1x8x256xf32> to vector<8x256xf32>
    %c8 = arith.constant 8 : index
    %c0_57 = arith.constant 0 : index
    %143 = vector.load %arg1[%c8, %c0_57] : memref<10x512xf32, #tpu.memory_space<vmem>>, vector<1x256xf32>
    %c9 = arith.constant 9 : index
    %c0_58 = arith.constant 0 : index
    %144 = vector.load %arg1[%c9, %c0_58] : memref<10x512xf32, #tpu.memory_space<vmem>>, vector<1x1xf32>
    %145 = vector.broadcast %143 : vector<1x256xf32> to vector<8x256xf32>
    %146 = arith.mulf %142, %145 : vector<8x256xf32>
    %cst_59 = arith.constant dense<0.000000e+00> : vector<8xf32>
    %147 = vector.multi_reduction <add>, %146, %cst_59 [1] : vector<8x256xf32> to vector<8xf32>
    %148 = vector.shape_cast %147 : vector<8xf32> to vector<8x1xf32>
    %149 = vector.broadcast %144 : vector<1x1xf32> to vector<8x1xf32>
    %150 = arith.addf %148, %149 : vector<8x1xf32>
    %c0_60 = arith.constant 0 : index
    %c0_61 = arith.constant 0 : index
    %151 = vector.load %arg4[%c0_60, %c0_61] : memref<8x1xf32, #tpu.memory_space<vmem>>, vector<8x1xf32>
    tpu.vector_store %arg4[%c0_60, %c0_61], %150 {strides = array<i32>} : memref<8x1xf32, #tpu.memory_space<vmem>>, vector<8x1xf32>,
    return
  }
}

</mosaic_0001>

<bundles_post_ra>
// kernel: tpu_custom_call.1
= control target key start
LH: loop header
LB: loop body
LE: loop exit
PB: predicated region body
PF: predicated region fallthrough
CT: control target
= control target key end

     0   :  { %9 = vsyncpa [#allocation6], 0  ;;  %s1801_s0 = inlined_call_operand.hbm [shape: bf16[8,256], index: 0, kind: input, shape index: {}]   ;;  %s1802_s1 = inlined_call_operand.hbm [shape: f32[10,512], index: 1, kind: input, shape index: {}]   ;;  %s1803_s2 = inlined_call_operand.hbm [shape: bf16[208,512], index: 2, kind: input, shape index: {}]   ;;  %s1804_s3 = inlined_call_operand.hbm [shape: bf16[1792,256], index: 3, kind: input, shape index: {}]   ;;  %s1805_s4 = inlined_call_operand.vmem [shape: f32[8,1], index: 4, kind: output, shape index: {}]  }
   0x1   :  { %10 = vsyncpa [#allocation8], 0  ;;  %s1586_s15 = smov [#allocation5]   ;;  %s1587_s17 = smov [#allocation7]  }
   0x2   :  { %s17_s16 = sshll.u32 %s1586_s15, 4  ;;  %s26_s18 = sshll.u32 %s1587_s17, 4  ;;  %s18_s16 = int_to_ptr.vmem [resolvable:$true] %s17_s16  ;;  %s1628_s18 = int_to_ptr.vmem [resolvable:$true] %s26_s18 }
   0x3   :  { %s1534_s21 = scalar_lea.hbm %s1801_s0, 128 }
   0x4   :  { %p1535_p0 = scmp.ne.s32.totalorder %s1801_s0, %s1534_s21  ;;  %p1538_p1 = scmp.lt.u32.totalorder %s1534_s21, %s1801_s0 }
   0x6   :  { %p1540_p2 = pnand %p1538_p1, %p1535_p0 }
   0x8   :  { %1543 = shalt.err (!%p1540_p2)
}
   0x9   :  { %s1544_s26 = scalar_lea.vmem %s18_s16, 128  ;;  %p1549_p4 = scmp.lt.s32.totalorder %s18_s16, %s18_s16 }
   0xa   :  { %p1545_p3 = scmp.ne.s32.totalorder %s18_s16, %s1544_s26  ;;  %p1550_p5 = scmp.lt.s32.totalorder %s1544_s26, %s1544_s26 }
   0xc   :  { %p1551_p6 = por %p1550_p5, %p1549_p4 }
   0xe   :  { %p1552_p7 = pnand %p1551_p6, %p1545_p3 }
  0x10   :  { %1555 = shalt.err (!%p1552_p7)
}
  0x11   :  { %20 = dma.hbm_to_vmem [thread:$0]  %s1801_s0, 128, %s18_s16, [#allocation6]  }
  0x12   :  { %s1556_s5 = scalar_lea.hbm %s1802_s1, 1024 }
  0x13   :  { %p1557_p8 = scmp.ne.s32.totalorder %s1802_s1, %s1556_s5  ;;  %p1560_p9 = scmp.lt.u32.totalorder %s1556_s5, %s1802_s1 }
  0x15   :  { %p1562_p10 = pnand %p1560_p9, %p1557_p8 }
  0x17   :  { %1565 = shalt.err (!%p1562_p10)
}
  0x18   :  { %s1566_s10 = scalar_lea.vmem %s1628_s18, 1024  ;;  %p1571_p12 = scmp.lt.s32.totalorder %s1628_s18, %s1628_s18 }
  0x19   :  { %p1567_p11 = scmp.ne.s32.totalorder %s1628_s18, %s1566_s10  ;;  %p1572_p13 = scmp.lt.s32.totalorder %s1566_s10, %s1566_s10 }
  0x1b   :  { %p1573_p0 = por %p1572_p13, %p1571_p12 }
  0x1d   :  { %p1574_p1 = pnand %p1573_p0, %p1567_p11 }
  0x1f   :  { %1577 = shalt.err (!%p1574_p1)
}
  0x20   :  { %s1588_s0 = smov 512   ;;  %s1589_s11 = smov 32  }
  0x21   :  { %32 = dma.hbm_to_vmem [thread:$0]  %s1802_s1, 1024, %s1628_s18, [#allocation8], %s1588_s0, %s1588_s0, %s1589_s11  }
  0x22   :  { %1578 = dma.done.wait [#allocation6], 128  }
  0x23   :  { %1579 = vsyncadd [#allocation6], 4294967168 }
  0x24   :  { %1580 = dma.done.wait [#allocation8], 1024  }
  0x25   :  { %1581 = vsyncadd [#allocation8], 4294966272  ;;  %s44_s14 = sld [smem:[#allocation0]]   ;;  %56 = sst [smem:[#allocation10]] %s1588_s0  ;;  %v1601_v0 = vmov 0  }
  0x26   :  { %58 = sst [smem:[#allocation10 + $0x1]] %s1588_s0  ;;  %s1590_s15 = smov [#allocation2]  }
  0x27   :  { %s52_s16 = sshll.u32 %s1590_s15, 4  ;;  %s1591_s17 = smov 4   ;;  %s53_s16 = int_to_ptr.vmem [resolvable:$true] %s52_s16 }
  0x28   :  { %60 = sst [smem:[#allocation10 + $0x2]] %s1591_s17  ;;  %s1592_s19 = smov 64  }
  0x29   :  { %62 = sst [smem:[#allocation10 + $0x3]] %s1592_s19  ;;  %s1593_s20 = smov 128  }
  0x2a   :  { %64 = sst [smem:[#allocation10 + $0x4]] %s1593_s20  ;;  %s1594_s22 = smov 2  }
  0x2b   :  { %s1473_s21 = sshll.u32 %s44_s14, 26  ;;  %66 = sst [smem:[#allocation10 + $0x5]] %s1594_s22 }
  0x2c   :  { %s1474_s1 = sadd.s32 134217728, %s1473_s21  ;;  %s1595_s18 = smov 256  }
  0x2d   :  { %68 = sst [smem:[#allocation10 + $0x6]] %s1595_s18  ;;  %s1596_s23 = smov [#allocation4]  }
  0x2e   :  { %70 = sst [smem:[#allocation10 + $0x7]] %s1592_s19  ;;  %s1597_s24 = smov [#allocation9]  }
  0x2f   :  { %72 = sst [smem:[#allocation10 + $0x8]] %s1591_s17  ;;  %s1598_s27 = smov [#allocation3]  }
  0x30   :  { %74 = dma.general %s1803_s2, 6656, %s53_s16, %s1596_s23, %s1597_s24, [#allocation10], %s1474_s1, 0  }
  0x31   :  { %91 = sst [smem:[#allocation12]] %s1595_s18  ;;  %s87_s28 = sshll.u32 %s1598_s27, 4  ;;  %s88_s28 = int_to_ptr.vmem [resolvable:$true] %s87_s28 }
  0x32   :  { %93 = sst [smem:[#allocation12 + $0x1]] %s1595_s18  ;;  %s1599_s29 = smov [#allocation4 + $0x1]  }
  0x33   :  { %95 = sst [smem:[#allocation12 + $0x2]] %s1594_s22  ;;  %s1600_s30 = smov [#allocation11]  }
  0x34   :  { %97 = sst [smem:[#allocation12 + $0x3]] %s1592_s19 }
  0x35   :  { %99 = sst [smem:[#allocation12 + $0x4]] %s1593_s20 }
  0x36   :  { %101 = sst [smem:[#allocation12 + $0x5]] %s1594_s22 }
  0x37   :  { %103 = sst [smem:[#allocation12 + $0x6]] %s1593_s20 }
  0x38   :  { %105 = sst [smem:[#allocation12 + $0x7]] %s1592_s19 }
  0x39   :  { %107 = sst [smem:[#allocation12 + $0x8]] %s1591_s17 }
  0x3a   :  { %109 = dma.general %s1804_s3, 28672, %s88_s28, %s1599_s29, %s1600_s30, [#allocation12], %s1474_s1, 0  }
  0x3b   :  { %110 = vst [vmem:[#allocation2 + $0x1a0] sm:$0xff] %v1601_v0  ;;  %111 = vst [vmem:[#allocation2 + $0x1a8] sm:$0xff] %v1601_v0  ;;  %v1665_v1 = vld [vmem:[#allocation5] sm:$0xff] }
  0x3c   :  { %112 = vst [vmem:[#allocation2 + $0x1b0] sm:$0xff] %v1601_v0  ;;  %113 = vst [vmem:[#allocation2 + $0x1b8] sm:$0xff] %v1601_v0 }
  0x3d   :  { %114 = vst [vmem:[#allocation2 + $0x1c0] sm:$0xff] %v1601_v0  ;;  %115 = vst [vmem:[#allocation2 + $0x1c8] sm:$0xff] %v1601_v0 }
  0x3e   :  { %116 = vst [vmem:[#allocation2 + $0x1d0] sm:$0xff] %v1601_v0  ;;  %117 = vst [vmem:[#allocation2 + $0x1d8] sm:$0xff] %v1601_v0 }
  0x3f   :  { %118 = vst [vmem:[#allocation2 + $0x1e0] sm:$0xff] %v1601_v0  ;;  %119 = vst [vmem:[#allocation2 + $0x1e8] sm:$0xff] %v1601_v0 }
  0x40   :  { %120 = vst [vmem:[#allocation2 + $0x1f0] sm:$0xff] %v1601_v0  ;;  %121 = vst [vmem:[#allocation2 + $0x1f8] sm:$0xff] %v1601_v0 }
  0x41   :  { %1582 = dma.done.wait [#allocation4], 6656 }
  0x42   :  { %1583 = vsyncadd [#allocation4], 4294960640  ;;  %v1478_v2 = vcombine.high %v1665_v1, %v1665_v1  ;;  %v128_v3 = vld [vmem:[#allocation2 + $0x8] sm:$0xff]  ;;  %v130_v4 = vld [vmem:[#allocation2 + $0x18] sm:$0xff] }
  0x43   :  { %v127_v5 = vld [vmem:[#allocation2] sm:$0xff]  ;;  %198 = vmatprep.subr.bf16.mxu0 %v128_v3  ;;  %239 = vmatprep.subr.bf16.mxu1 %v130_v4  ;;  %v129_v6 = vld [vmem:[#allocation2 + $0x10] sm:$0xff]  ;;  %v132_v7 = vld [vmem:[#allocation2 + $0x28] sm:$0xff]  ;;  %v1477_v4 = vcombine.low %v1665_v1, %v1665_v1 }
  0x44   :  { %230 = vmatprep.mubr.bf16.mxu0 %v1478_v2  ;;  %271 = vmatprep.mubr.bf16.mxu1 %v1478_v2  ;;  %v134_v8 = vld [vmem:[#allocation2 + $0x38] sm:$0xff]  ;;  %v131_v9 = vld [vmem:[#allocation2 + $0x20] sm:$0xff]  ;;  %v133_v10 = vld [vmem:[#allocation2 + $0x30] sm:$0xff] }
  0x45   :  { %199 = vmatpush1.bf16.msra.mxu0 %v127_v5  ;;  %240 = vmatpush1.bf16.msra.mxu1 %v129_v6  ;;  %v136_v11 = vld [vmem:[#allocation2 + $0x48] sm:$0xff]  ;;  %v138_v12 = vld [vmem:[#allocation2 + $0x58] sm:$0xff]  ;;  %v135_v13 = vld [vmem:[#allocation2 + $0x40] sm:$0xff] }
  0x46   :  { %200 = vmatprep.subr.bf16.mxu0 %v132_v7  ;;  %241 = vmatprep.subr.bf16.mxu1 %v134_v8  ;;  %v137_v14 = vld [vmem:[#allocation2 + $0x50] sm:$0xff]  ;;  %v140_v15 = vld [vmem:[#allocation2 + $0x68] sm:$0xff]  ;;  %v142_v16 = vld [vmem:[#allocation2 + $0x78] sm:$0xff] }
  0x47   :  { %v139_v17 = vld [vmem:[#allocation2 + $0x60] sm:$0xff]  ;;  %v141_v18 = vld [vmem:[#allocation2 + $0x70] sm:$0xff]  ;;  %v144_v19 = vld [vmem:[#allocation2 + $0x88] sm:$0xff] }
  0x48   :  { %v146_v20 = vld [vmem:[#allocation2 + $0x98] sm:$0xff]  ;;  %v143_v21 = vld [vmem:[#allocation2 + $0x80] sm:$0xff]  ;;  %v145_v22 = vld [vmem:[#allocation2 + $0x90] sm:$0xff] }
  0x49   :  { %201 = vmatpush1.bf16.msra.mxu0 %v131_v9  ;;  %242 = vmatpush1.bf16.msra.mxu1 %v133_v10  ;;  %v148_v23 = vld [vmem:[#allocation2 + $0xa8] sm:$0xff]  ;;  %v150_v24 = vld [vmem:[#allocation2 + $0xb8] sm:$0xff]  ;;  %v147_v25 = vld [vmem:[#allocation2 + $0xa0] sm:$0xff] }
  0x4a   :  { %202 = vmatprep.subr.bf16.mxu0 %v136_v11  ;;  %243 = vmatprep.subr.bf16.mxu1 %v138_v12  ;;  %v149_v26 = vld [vmem:[#allocation2 + $0xb0] sm:$0xff]  ;;  %v152_v27 = vld [vmem:[#allocation2 + $0xc8] sm:$0xff]  ;;  %v154_v28 = vld [vmem:[#allocation2 + $0xd8] sm:$0xff] }
  0x4b   :  { %v151_v29 = vld [vmem:[#allocation2 + $0xc0] sm:$0xff]  ;;  %v153_v30 = vld [vmem:[#allocation2 + $0xd0] sm:$0xff]  ;;  %v156_v31 = vld [vmem:[#allocation2 + $0xe8] sm:$0xff] }
  0x4c   :  { %v158_v32 = vld [vmem:[#allocation2 + $0xf8] sm:$0xff]  ;;  %v155_v33 = vld [vmem:[#allocation2 + $0xe0] sm:$0xff]  ;;  %v157_v34 = vld [vmem:[#allocation2 + $0xf0] sm:$0xff] }
  0x4d   :  { %203 = vmatpush1.bf16.msra.mxu0 %v135_v13  ;;  %244 = vmatpush1.bf16.msra.mxu1 %v137_v14  ;;  %v160_v35 = vld [vmem:[#allocation2 + $0x108] sm:$0xff]  ;;  %v162_v36 = vld [vmem:[#allocation2 + $0x118] sm:$0xff]  ;;  %v159_v37 = vld [vmem:[#allocation2 + $0x100] sm:$0xff] }
  0x4e   :  { %204 = vmatprep.subr.bf16.mxu0 %v140_v15  ;;  %245 = vmatprep.subr.bf16.mxu1 %v142_v16  ;;  %v161_v38 = vld [vmem:[#allocation2 + $0x110] sm:$0xff]  ;;  %v164_v39 = vld [vmem:[#allocation2 + $0x128] sm:$0xff]  ;;  %v166_v40 = vld [vmem:[#allocation2 + $0x138] sm:$0xff] }
  0x4f   :  { %v163_v41 = vld [vmem:[#allocation2 + $0x120] sm:$0xff]  ;;  %v165_v42 = vld [vmem:[#allocation2 + $0x130] sm:$0xff]  ;;  %v168_v43 = vld [vmem:[#allocation2 + $0x148] sm:$0xff] }
  0x50   :  { %v170_v44 = vld [vmem:[#allocation2 + $0x158] sm:$0xff]  ;;  %v167_v45 = vld [vmem:[#allocation2 + $0x140] sm:$0xff]  ;;  %v169_v46 = vld [vmem:[#allocation2 + $0x150] sm:$0xff] }
  0x51   :  { %205 = vmatpush1.bf16.msra.mxu0 %v139_v17  ;;  %246 = vmatpush1.bf16.msra.mxu1 %v141_v18  ;;  %v172_v47 = vld [vmem:[#allocation2 + $0x168] sm:$0xff]  ;;  %v174_v48 = vld [vmem:[#allocation2 + $0x178] sm:$0xff]  ;;  %v171_v49 = vld [vmem:[#allocation2 + $0x160] sm:$0xff] }
  0x52   :  { %206 = vmatprep.subr.bf16.mxu0 %v144_v19  ;;  %247 = vmatprep.subr.bf16.mxu1 %v146_v20  ;;  %v173_v50 = vld [vmem:[#allocation2 + $0x170] sm:$0xff]  ;;  %v176_v51 = vld [vmem:[#allocation2 + $0x188] sm:$0xff]  ;;  %v178_v52 = vld [vmem:[#allocation2 + $0x198] sm:$0xff] }
  0x53   :  { %v175_v53 = vld [vmem:[#allocation2 + $0x180] sm:$0xff]  ;;  %v177_v54 = vld [vmem:[#allocation2 + $0x190] sm:$0xff]  ;;  %v180_v55 = vld [vmem:[#allocation2 + $0x1a8] sm:$0xff] }
  0x54   :  { %v182_v56 = vld [vmem:[#allocation2 + $0x1b8] sm:$0xff]  ;;  %v179_v57 = vld [vmem:[#allocation2 + $0x1a0] sm:$0xff]  ;;  %v181_v58 = vld [vmem:[#allocation2 + $0x1b0] sm:$0xff] }
  0x55   :  { %207 = vmatpush1.bf16.msra.mxu0 %v143_v21  ;;  %248 = vmatpush1.bf16.msra.mxu1 %v145_v22  ;;  %v184_v59 = vld [vmem:[#allocation2 + $0x1c8] sm:$0xff]  ;;  %v186_v60 = vld [vmem:[#allocation2 + $0x1d8] sm:$0xff]  ;;  %v183_v61 = vld [vmem:[#allocation2 + $0x1c0] sm:$0xff] }
  0x56   :  { %208 = vmatprep.subr.bf16.mxu0 %v148_v23  ;;  %249 = vmatprep.subr.bf16.mxu1 %v150_v24  ;;  %v185_v62 = vld [vmem:[#allocation2 + $0x1d0] sm:$0xff]  ;;  %v188_v63 = vld [vmem:[#allocation2 + $0x1e8] sm:$0xff]  ;;  %v190_v0 = vld [vmem:[#allocation2 + $0x1f8] sm:$0xff] }
  0x57   :  { %v187_v2 = vld [vmem:[#allocation2 + $0x1e0] sm:$0xff]  ;;  %v189_v3 = vld [vmem:[#allocation2 + $0x1f0] sm:$0xff] }
  0x59   :  { %209 = vmatpush1.bf16.msra.mxu0 %v147_v25  ;;  %250 = vmatpush1.bf16.msra.mxu1 %v149_v26 }
  0x5a   :  { %210 = vmatprep.subr.bf16.mxu0 %v152_v27  ;;  %251 = vmatprep.subr.bf16.mxu1 %v154_v28 }
  0x5d   :  { %211 = vmatpush1.bf16.msra.mxu0 %v151_v29  ;;  %252 = vmatpush1.bf16.msra.mxu1 %v153_v30 }
  0x5e   :  { %212 = vmatprep.subr.bf16.mxu0 %v156_v31  ;;  %253 = vmatprep.subr.bf16.mxu1 %v158_v32 }
  0x61   :  { %213 = vmatpush1.bf16.msra.mxu0 %v155_v33  ;;  %254 = vmatpush1.bf16.msra.mxu1 %v157_v34 }
  0x62   :  { %214 = vmatprep.subr.bf16.mxu0 %v160_v35  ;;  %255 = vmatprep.subr.bf16.mxu1 %v162_v36 }
  0x65   :  { %215 = vmatpush1.bf16.msra.mxu0 %v159_v37  ;;  %256 = vmatpush1.bf16.msra.mxu1 %v161_v38 }
  0x66   :  { %216 = vmatprep.subr.bf16.mxu0 %v164_v39  ;;  %257 = vmatprep.subr.bf16.mxu1 %v166_v40 }
  0x69   :  { %217 = vmatpush1.bf16.msra.mxu0 %v163_v41  ;;  %258 = vmatpush1.bf16.msra.mxu1 %v165_v42 }
  0x6a   :  { %218 = vmatprep.subr.bf16.mxu0 %v168_v43  ;;  %259 = vmatprep.subr.bf16.mxu1 %v170_v44 }
  0x6d   :  { %219 = vmatpush1.bf16.msra.mxu0 %v167_v45  ;;  %260 = vmatpush1.bf16.msra.mxu1 %v169_v46 }
  0x6e   :  { %220 = vmatprep.subr.bf16.mxu0 %v172_v47  ;;  %261 = vmatprep.subr.bf16.mxu1 %v174_v48 }
  0x71   :  { %221 = vmatpush1.bf16.msra.mxu0 %v171_v49  ;;  %262 = vmatpush1.bf16.msra.mxu1 %v173_v50 }
  0x72   :  { %222 = vmatprep.subr.bf16.mxu0 %v176_v51  ;;  %263 = vmatprep.subr.bf16.mxu1 %v178_v52 }
  0x75   :  { %223 = vmatpush1.bf16.msra.mxu0 %v175_v53  ;;  %264 = vmatpush1.bf16.msra.mxu1 %v177_v54 }
  0x76   :  { %224 = vmatprep.subr.bf16.mxu0 %v180_v55  ;;  %265 = vmatprep.subr.bf16.mxu1 %v182_v56 }
  0x79   :  { %225 = vmatpush1.bf16.msra.mxu0 %v179_v57  ;;  %266 = vmatpush1.bf16.msra.mxu1 %v181_v58 }
  0x7a   :  { %226 = vmatprep.subr.bf16.mxu0 %v184_v59  ;;  %267 = vmatprep.subr.bf16.mxu1 %v186_v60 }
  0x7d   :  { %227 = vmatpush1.bf16.msra.mxu0 %v183_v61  ;;  %268 = vmatpush1.bf16.msra.mxu1 %v185_v62 }
  0x7e   :  { %228 = vmatprep.subr.bf16.mxu0 %v188_v63  ;;  %269 = vmatprep.subr.bf16.mxu1 %v190_v0 }
  0x81   :  { %229 = vmatpush1.bf16.msra.mxu0 %v187_v2  ;;  %270 = vmatpush1.bf16.msra.mxu1 %v189_v3 }
  0x84   :  { %231 = vmatmul.mubr.bf16.vlgmr.msra.gmra.mrb[0].mxu0 %v1477_v4  ;;  %272 = vmatmul.mubr.bf16.vlgmr.msra.gmra.mrb[0].mxu1 %v1477_v4 }
 0x157   :  { %v1671_v5 = vpop.f32.mrb[0].mxu0  ;;  %v1673_v6 = vpop.f32.mrb[0].mxu1 }
 0x158   :  { %v283_v7 = vrot.slane %v1671_v5, 4  ;;  %v307_v8 = vmul.f32 %v1671_v5, %v1671_v5  ;;  %v295_v9 = vrot.slane %v1673_v6, 4  ;;  %v309_v10 = vmul.f32 %v1673_v6, %v1673_v6  ;;  %v1681_v11 = vpop.f32.mrb[1].mxu0  ;;  %v1683_v1 = vpop.f32.mrb[1].mxu1 }
 0x159   :  { %v289_v12 = vrot.slane %v1681_v11, 4  ;;  %v308_v13 = vmul.f32 %v1681_v11, %v1681_v11  ;;  %v301_v14 = vrot.slane %v1683_v1, 4  ;;  %v310_v15 = vmul.f32 %v1683_v1, %v1683_v1  ;;  %v236_v16 = vpop.f32.mrb[2].mxu0  ;;  %v277_v17 = vpop.f32.mrb[2].mxu1 }
 0x15a   :  { %v284_v18 = vadd.f32 %v283_v7, %v1671_v5  ;;  %v311_v19 = vrot.slane %v307_v8, 4  ;;  %v296_v20 = vadd.f32 %v295_v9, %v1673_v6  ;;  %v323_v21 = vrot.slane %v309_v10, 4  ;;  %v237_v22 = vpop.f32.mrb[3].mxu0  ;;  %v278_v23 = vpop.f32.mrb[3].mxu1 }
 0x15b   :  { %v290_v24 = vadd.f32 %v289_v12, %v1681_v11  ;;  %v317_v25 = vrot.slane %v308_v13, 4  ;;  %v302_v26 = vadd.f32 %v301_v14, %v1683_v1  ;;  %v329_v27 = vrot.slane %v310_v15, 4 }
 0x15c   :  { %v285_v28 = vrot.slane %v284_v18, 2  ;;  %v312_v29 = vadd.f32 %v311_v19, %v307_v8  ;;  %v297_v30 = vrot.slane %v296_v20, 2  ;;  %v324_v31 = vadd.f32 %v323_v21, %v309_v10 }
 0x15d   :  { %v291_v32 = vrot.slane %v290_v24, 2  ;;  %v318_v33 = vadd.f32 %v317_v25, %v308_v13  ;;  %v303_v34 = vrot.slane %v302_v26, 2  ;;  %v330_v35 = vadd.f32 %v329_v27, %v310_v15 }
 0x15e   :  { %v286_v36 = vadd.f32 %v285_v28, %v284_v18  ;;  %v313_v37 = vrot.slane %v312_v29, 2  ;;  %v298_v38 = vadd.f32 %v297_v30, %v296_v20  ;;  %v325_v39 = vrot.slane %v324_v31, 2 }
 0x15f   :  { %v292_v40 = vadd.f32 %v291_v32, %v290_v24  ;;  %v319_v41 = vrot.slane %v318_v33, 2  ;;  %v304_v42 = vadd.f32 %v303_v34, %v302_v26  ;;  %v331_v43 = vrot.slane %v330_v35, 2 }
 0x160   :  { %v287_v44 = vrot.slane %v286_v36, 1  ;;  %v314_v45 = vadd.f32 %v313_v37, %v312_v29  ;;  %v299_v46 = vrot.slane %v298_v38, 1  ;;  %v326_v47 = vadd.f32 %v325_v39, %v324_v31 }
 0x161   :  { %v293_v48 = vrot.slane %v292_v40, 1  ;;  %v320_v49 = vadd.f32 %v319_v41, %v318_v33  ;;  %v305_v50 = vrot.slane %v304_v42, 1  ;;  %v332_v51 = vadd.f32 %v331_v43, %v330_v35  ;;  %v280_v43 = vld [vmem:[#allocation7] ss:$8 sm:$0xf] }
 0x162   :  { %v288_v52 = vadd.f32 %v287_v44, %v286_v36  ;;  %v315_v53 = vrot.slane %v314_v45, 1  ;;  %v300_v54 = vadd.f32 %v299_v46, %v298_v38  ;;  %v327_v55 = vrot.slane %v326_v47, 1 }
 0x163   :  { %v294_v56 = vadd.f32 %v293_v48, %v292_v40  ;;  %v321_v57 = vrot.slane %v320_v49, 1  ;;  %v306_v58 = vadd.f32 %v305_v50, %v304_v42  ;;  %v333_v59 = vrot.slane %v332_v51, 1 }
 0x164   :  { %v316_v60 = vadd.f32 %v315_v53, %v314_v45  ;;  %v335_v61 = vmul.f32 0.125, %v288_v52  ;;  %v328_v62 = vadd.f32 %v327_v55, %v326_v47  ;;  %v337_v63 = vmul.f32 0.125, %v300_v54 }
 0x165   :  { %v322_v0 = vadd.f32 %v321_v57, %v320_v49  ;;  %v336_v2 = vmul.f32 0.125, %v294_v56  ;;  %v334_v3 = vadd.f32 %v333_v59, %v332_v51  ;;  %v338_v4 = vmul.f32 0.125, %v306_v58 }
 0x166   :  { %v339_v7 = vmul.f32 0.125, %v316_v60  ;;  %v343_v8 = vmul.f32 %v335_v61, %v335_v61  ;;  %v341_v9 = vmul.f32 0.125, %v328_v62  ;;  %v345_v10 = vmul.f32 %v337_v63, %v337_v63 }
 0x167   :  { %v340_v12 = vmul.f32 0.125, %v322_v0  ;;  %v344_v13 = vmul.f32 %v336_v2, %v336_v2  ;;  %v342_v14 = vmul.f32 0.125, %v334_v3  ;;  %v346_v15 = vmul.f32 %v338_v4, %v338_v4 }
 0x168   :  { %v347_v16 = vsub.f32 %v339_v7, %v343_v8  ;;  %v349_v17 = vsub.f32 %v341_v9, %v345_v10  ;;  %v1602_v28 = vmov 1966171168   ;;  %v372_v30 = vlaneseq  ;;  %v282_v10 = vld [vmem:[#allocation7 + $0x1] ss:$8 sm:$0xf] }
 0x169   :  { %v348_v18 = vsub.f32 %v340_v12, %v344_v13  ;;  %v350_v19 = vsub.f32 %v342_v14, %v346_v15  ;;  %v370_v29 = vunpack.c.l.s4 %v1602_v28 }
 0x16a   :  { %v351_v20 = vmax.f32 %v347_v16, 0.0  ;;  %v353_v21 = vmax.f32 %v349_v17, 0.0  ;;  %v373_v32 = vshrl.u32 %v372_v30, 7 }
 0x16b   :  { %v352_v22 = vmax.f32 %v348_v18, 0.0  ;;  %v354_v23 = vmax.f32 %v350_v19, 0.0  ;;  %v371_v31 = vunpack.c.0.s8 %v370_v29 }
 0x16c   :  { %v355_v24 = vadd.f32 1e-05, %v351_v20  ;;  %v357_v25 = vadd.f32 1e-05, %v353_v21  ;;  %v1699_v44 = vsub.s32 0, %v373_v32  ;;  %v1702_v46 = vsub.s32 1, %v373_v32 }
 0x16d   :  { %v356_v26 = vadd.f32 1e-05, %v352_v22  ;;  %v358_v27 = vadd.f32 1e-05, %v354_v23  ;;  %v1695_v35 = vsub.s32 %v371_v31, %v373_v32  ;;  %v1704_v47 = vsub.s32 2, %v373_v32 }
 0x16e   :  { %1510 = vrsqrt.f32 %v355_v24  ;;  %v1706_v48 = vsub.s32 3, %v373_v32 }
 0x16f   :  { %1512 = vrsqrt.f32 %v357_v25 }
 0x170   :  { %1514 = vrsqrt.f32 %v356_v26 }
 0x171   :  { %1516 = vrsqrt.f32 %v358_v27 }
 0x178   :  { %v1511_v33 = vpop.eup %1510 }
 0x179   :  { %v1513_v34 = vpop.eup %1512 }
 0x17a   :  { %v1515_v36 = vpop.eup %1514 }
 0x17b   :  { %v1517_v37 = vpop.eup %1516  ;;  %v367_v38 = vcombine.low %v1511_v33, %v1515_v36 }
 0x17c   :  { %v368_v39 = vcombine.low %v1513_v34, %v1517_v37 }
 0x17d   :  { %v375_v40 = vrot.slane %v367_v38, %v1695_v35 }
 0x17e   :  { %v382_v41 = vrot.slane %v368_v39, %v1695_v35 }
 0x180   :  { %v383_v42 = vcombine.low %v375_v40, %v382_v41 }
 0x182   :  { %v390_v45 = vrot.slane %v383_v42, %v1695_v35 }
 0x184   :  { %v392_v49 = vmul.f32 %v390_v45, %v280_v43 }
 0x186   :  { %v397_v50 = vrot.slane %v392_v49, %v1699_v44  ;;  %v401_v51 = vrot.slane %v392_v49, %v1702_v46  ;;  %v405_v52 = vrot.slane %v392_v49, %v1704_v47  ;;  %v409_v53 = vrot.slane %v392_v49, %v1706_v48 }
 0x188   :  { %v414_v54 = vmul.f32 %v397_v50, %v335_v61  ;;  %v415_v55 = vmul.f32 %v401_v51, %v336_v2  ;;  %v416_v56 = vmul.f32 %v405_v52, %v337_v63  ;;  %v417_v57 = vmul.f32 %v409_v53, %v338_v4 }
 0x189   :  { %v448_v58 = vmul.f32 %v397_v50, %v1671_v5  ;;  %v449_v59 = vmul.f32 %v401_v51, %v1681_v11  ;;  %v450_v60 = vmul.f32 %v405_v52, %v1673_v6  ;;  %v451_v62 = vmul.f32 %v409_v53, %v1683_v1 }
 0x18a   :  { %v422_v0 = vcombine.low %v414_v54, %v415_v55  ;;  %v423_v3 = vcombine.low %v416_v56, %v417_v57 }
 0x18c   :  { %v430_v7 = vrot.slane %v422_v0, %v1695_v35  ;;  %v437_v8 = vrot.slane %v423_v3, %v1695_v35 }
 0x18e   :  { %v438_v9 = vcombine.low %v430_v7, %v437_v8 }
 0x190   :  { %v445_v61 = vrot.slane %v438_v9, %v1695_v35 }
 0x192   :  { %v447_v63 = vsub.f32 %v282_v10, %v445_v61 }
 0x194   :  { %v456_v2 = vrot.slane %v447_v63, %v1699_v44  ;;  %v460_v5 = vrot.slane %v447_v63, %v1702_v46  ;;  %v464_v11 = vrot.slane %v447_v63, %v1704_v47  ;;  %v468_v6 = vrot.slane %v447_v63, %v1706_v48 }
 0x196   :  { %v473_v1 = vadd.f32 %v456_v2, %v448_v58  ;;  %v474_v4 = vadd.f32 %v460_v5, %v449_v59  ;;  %v475_v12 = vadd.f32 %v464_v11, %v450_v60  ;;  %v476_v13 = vadd.f32 %v468_v6, %v451_v62 }
 0x198   :  { %v477_v14 = vmax.f32 %v473_v1, 0.0  ;;  %v478_v15 = vmax.f32 %v474_v4, 0.0  ;;  %v479_v16 = vmax.f32 %v475_v12, 0.0  ;;  %v480_v17 = vmax.f32 %v476_v13, 0.0 }
 0x19a   :  { %v1723_v18 = vpack.c.bf16 %v477_v14, %v477_v14  ;;  %v482_v19 = vpack.c.bf16 %v478_v15, %v478_v15  ;;  %v1725_v20 = vpack.c.bf16 %v479_v16, %v479_v16  ;;  %v1727_v21 = vpack.c.bf16 %v480_v17, %v480_v17 }
 0x19b   :  { %1584 = dma.done.wait [#allocation4 + $0x1], 28672 }
 0x19c   :  { %1585 = vsyncadd [#allocation4 + $0x1], 4294938624  ;;  %585 = vmatprep.mubr.bf16.mxu0 %v482_v19  ;;  %731 = vmatprep.mubr.bf16.mxu1 %v482_v19  ;;  %v490_v22 = vld [vmem:[#allocation3 + $0x8] sm:$0xff]  ;;  %v489_v24 = vld [vmem:[#allocation3] sm:$0xff]  ;;  %vm1452_vm0 = vcmask 7168  }
 0x19d   :  { %v636_v23 = vld [vmem:[#allocation3 + $0x208] sm:$0xff]  ;;  %553 = vmatprep.subr.bf16.mxu0 %v490_v22  ;;  %v635_v25 = vld [vmem:[#allocation3 + $0x200] sm:$0xff]  ;;  %v492_v26 = vld [vmem:[#allocation3 + $0x18] sm:$0xff] }
 0x19e   :  { %699 = vmatprep.subr.bf16.mxu1 %v636_v23  ;;  %v638_v27 = vld [vmem:[#allocation3 + $0x218] sm:$0xff]  ;;  %554 = vmatpush1.bf16.msra.mxu0 %v489_v24  ;;  %v491_v28 = vld [vmem:[#allocation3 + $0x10] sm:$0xff]  ;;  %v494_v30 = vld [vmem:[#allocation3 + $0x28] sm:$0xff] }
 0x19f   :  { %700 = vmatpush1.bf16.msra.mxu1 %v635_v25  ;;  %555 = vmatprep.subr.bf16.mxu0 %v492_v26  ;;  %v637_v29 = vld [vmem:[#allocation3 + $0x210] sm:$0xff]  ;;  %v640_v31 = vld [vmem:[#allocation3 + $0x228] sm:$0xff]  ;;  %v493_v32 = vld [vmem:[#allocation3 + $0x20] sm:$0xff] }
 0x1a0   :  { %701 = vmatprep.subr.bf16.mxu1 %v638_v27  ;;  %v639_v33 = vld [vmem:[#allocation3 + $0x220] sm:$0xff]  ;;  %v496_v34 = vld [vmem:[#allocation3 + $0x38] sm:$0xff]  ;;  %v495_v37 = vld [vmem:[#allocation3 + $0x30] sm:$0xff] }
 0x1a1   :  { %v642_v36 = vld [vmem:[#allocation3 + $0x238] sm:$0xff]  ;;  %v641_v38 = vld [vmem:[#allocation3 + $0x230] sm:$0xff]  ;;  %v498_v39 = vld [vmem:[#allocation3 + $0x48] sm:$0xff] }
 0x1a2   :  { %556 = vmatpush1.bf16.msra.mxu0 %v491_v28  ;;  %v644_v40 = vld [vmem:[#allocation3 + $0x248] sm:$0xff]  ;;  %v497_v41 = vld [vmem:[#allocation3 + $0x40] sm:$0xff]  ;;  %v500_v43 = vld [vmem:[#allocation3 + $0x58] sm:$0xff] }
 0x1a3   :  { %702 = vmatpush1.bf16.msra.mxu1 %v637_v29  ;;  %557 = vmatprep.subr.bf16.mxu0 %v494_v30  ;;  %v643_v42 = vld [vmem:[#allocation3 + $0x240] sm:$0xff]  ;;  %v646_v45 = vld [vmem:[#allocation3 + $0x258] sm:$0xff]  ;;  %v499_v49 = vld [vmem:[#allocation3 + $0x50] sm:$0xff] }
 0x1a4   :  { %703 = vmatprep.subr.bf16.mxu1 %v640_v31  ;;  %v645_v50 = vld [vmem:[#allocation3 + $0x250] sm:$0xff]  ;;  %v502_v51 = vld [vmem:[#allocation3 + $0x68] sm:$0xff]  ;;  %v501_v53 = vld [vmem:[#allocation3 + $0x60] sm:$0xff] }
 0x1a5   :  { %v648_v52 = vld [vmem:[#allocation3 + $0x268] sm:$0xff]  ;;  %v647_v54 = vld [vmem:[#allocation3 + $0x260] sm:$0xff]  ;;  %v504_v55 = vld [vmem:[#allocation3 + $0x78] sm:$0xff] }
 0x1a6   :  { %558 = vmatpush1.bf16.msra.mxu0 %v493_v32  ;;  %v650_v56 = vld [vmem:[#allocation3 + $0x278] sm:$0xff]  ;;  %v503_v57 = vld [vmem:[#allocation3 + $0x70] sm:$0xff]  ;;  %v506_v59 = vld [vmem:[#allocation3 + $0x88] sm:$0xff] }
 0x1a7   :  { %704 = vmatpush1.bf16.msra.mxu1 %v639_v33  ;;  %559 = vmatprep.subr.bf16.mxu0 %v496_v34  ;;  %v649_v58 = vld [vmem:[#allocation3 + $0x270] sm:$0xff]  ;;  %v652_v60 = vld [vmem:[#allocation3 + $0x288] sm:$0xff]  ;;  %v505_v62 = vld [vmem:[#allocation3 + $0x80] sm:$0xff] }
 0x1a8   :  { %705 = vmatprep.subr.bf16.mxu1 %v642_v36  ;;  %v651_v0 = vld [vmem:[#allocation3 + $0x280] sm:$0xff]  ;;  %v508_v3 = vld [vmem:[#allocation3 + $0x98] sm:$0xff]  ;;  %v507_v8 = vld [vmem:[#allocation3 + $0x90] sm:$0xff] }
 0x1a9   :  { %v654_v7 = vld [vmem:[#allocation3 + $0x298] sm:$0xff]  ;;  %v653_v9 = vld [vmem:[#allocation3 + $0x290] sm:$0xff]  ;;  %v510_v10 = vld [vmem:[#allocation3 + $0xa8] sm:$0xff] }
 0x1aa   :  { %560 = vmatpush1.bf16.msra.mxu0 %v495_v37  ;;  %v656_v61 = vld [vmem:[#allocation3 + $0x2a8] sm:$0xff]  ;;  %v509_v63 = vld [vmem:[#allocation3 + $0xa0] sm:$0xff]  ;;  %v512_v5 = vld [vmem:[#allocation3 + $0xb8] sm:$0xff] }
 0x1ab   :  { %706 = vmatpush1.bf16.msra.mxu1 %v641_v38  ;;  %561 = vmatprep.subr.bf16.mxu0 %v498_v39  ;;  %v655_v2 = vld [vmem:[#allocation3 + $0x2a0] sm:$0xff]  ;;  %v658_v11 = vld [vmem:[#allocation3 + $0x2b8] sm:$0xff]  ;;  %v511_v6 = vld [vmem:[#allocation3 + $0xb0] sm:$0xff] }
 0x1ac   :  { %707 = vmatprep.subr.bf16.mxu1 %v644_v40  ;;  %v657_v1 = vld [vmem:[#allocation3 + $0x2b0] sm:$0xff]  ;;  %v514_v4 = vld [vmem:[#allocation3 + $0xc8] sm:$0xff]  ;;  %v513_v13 = vld [vmem:[#allocation3 + $0xc0] sm:$0xff] }
 0x1ad   :  { %v660_v12 = vld [vmem:[#allocation3 + $0x2c8] sm:$0xff]  ;;  %v659_v14 = vld [vmem:[#allocation3 + $0x2c0] sm:$0xff]  ;;  %v516_v15 = vld [vmem:[#allocation3 + $0xd8] sm:$0xff] }
 0x1ae   :  { %562 = vmatpush1.bf16.msra.mxu0 %v497_v41  ;;  %v662_v16 = vld [vmem:[#allocation3 + $0x2d8] sm:$0xff]  ;;  %v515_v17 = vld [vmem:[#allocation3 + $0xd0] sm:$0xff]  ;;  %v518_v22 = vld [vmem:[#allocation3 + $0xe8] sm:$0xff] }
 0x1af   :  { %708 = vmatpush1.bf16.msra.mxu1 %v643_v42  ;;  %563 = vmatprep.subr.bf16.mxu0 %v500_v43  ;;  %v661_v19 = vld [vmem:[#allocation3 + $0x2d0] sm:$0xff]  ;;  %v664_v23 = vld [vmem:[#allocation3 + $0x2e8] sm:$0xff]  ;;  %v517_v24 = vld [vmem:[#allocation3 + $0xe0] sm:$0xff] }
 0x1b0   :  { %709 = vmatprep.subr.bf16.mxu1 %v646_v45  ;;  %v663_v25 = vld [vmem:[#allocation3 + $0x2e0] sm:$0xff]  ;;  %v520_v26 = vld [vmem:[#allocation3 + $0xf8] sm:$0xff]  ;;  %v519_v28 = vld [vmem:[#allocation3 + $0xf0] sm:$0xff] }
 0x1b1   :  { %v666_v27 = vld [vmem:[#allocation3 + $0x2f8] sm:$0xff]  ;;  %v665_v29 = vld [vmem:[#allocation3 + $0x2f0] sm:$0xff]  ;;  %v522_v30 = vld [vmem:[#allocation3 + $0x108] sm:$0xff] }
 0x1b2   :  { %564 = vmatpush1.bf16.msra.mxu0 %v499_v49  ;;  %v668_v31 = vld [vmem:[#allocation3 + $0x308] sm:$0xff]  ;;  %v521_v32 = vld [vmem:[#allocation3 + $0x100] sm:$0xff]  ;;  %v524_v34 = vld [vmem:[#allocation3 + $0x118] sm:$0xff] }
 0x1b3   :  { %710 = vmatpush1.bf16.msra.mxu1 %v645_v50  ;;  %565 = vmatprep.subr.bf16.mxu0 %v502_v51  ;;  %v667_v33 = vld [vmem:[#allocation3 + $0x300] sm:$0xff]  ;;  %v670_v36 = vld [vmem:[#allocation3 + $0x318] sm:$0xff]  ;;  %v523_v37 = vld [vmem:[#allocation3 + $0x110] sm:$0xff] }
 0x1b4   :  { %711 = vmatprep.subr.bf16.mxu1 %v648_v52  ;;  %v669_v38 = vld [vmem:[#allocation3 + $0x310] sm:$0xff]  ;;  %v526_v39 = vld [vmem:[#allocation3 + $0x128] sm:$0xff]  ;;  %v525_v41 = vld [vmem:[#allocation3 + $0x120] sm:$0xff] }
 0x1b5   :  { %v672_v40 = vld [vmem:[#allocation3 + $0x328] sm:$0xff]  ;;  %v671_v42 = vld [vmem:[#allocation3 + $0x320] sm:$0xff]  ;;  %v528_v43 = vld [vmem:[#allocation3 + $0x138] sm:$0xff] }
 0x1b6   :  { %566 = vmatpush1.bf16.msra.mxu0 %v501_v53  ;;  %v527_v45 = vld [vmem:[#allocation3 + $0x130] sm:$0xff]  ;;  %v530_v50 = vld [vmem:[#allocation3 + $0x148] sm:$0xff]  ;;  %v675_v52 = vld [vmem:[#allocation3 + $0x340] sm:$0xff] }
 0x1b7   :  { %712 = vmatpush1.bf16.msra.mxu1 %v647_v54  ;;  %567 = vmatprep.subr.bf16.mxu0 %v504_v55  ;;  %v673_v49 = vld [vmem:[#allocation3 + $0x330] sm:$0xff]  ;;  %v676_v51 = vld [vmem:[#allocation3 + $0x348] sm:$0xff]  ;;  %v532_v53 = vld [vmem:[#allocation3 + $0x158] sm:$0xff] }
 0x1b8   :  { %713 = vmatprep.subr.bf16.mxu1 %v650_v56  ;;  %v678_v54 = vld [vmem:[#allocation3 + $0x358] sm:$0xff]  ;;  %v531_v55 = vld [vmem:[#allocation3 + $0x150] sm:$0xff] }
 0x1b9   :  { %v677_v56 = vld [vmem:[#allocation3 + $0x350] sm:$0xff] }
 0x1ba   :  { %568 = vmatpush1.bf16.msra.mxu0 %v503_v57  ;;  %v534_v57 = vld [vmem:[#allocation3 + $0x168] sm:$0xff] }
 0x1bb   :  { %714 = vmatpush1.bf16.msra.mxu1 %v649_v58  ;;  %569 = vmatprep.subr.bf16.mxu0 %v506_v59  ;;  %v680_v58 = vld [vmem:[#allocation3 + $0x368] sm:$0xff]  ;;  %v533_v59 = vld [vmem:[#allocation3 + $0x160] sm:$0xff] }
 0x1bc   :  { %715 = vmatprep.subr.bf16.mxu1 %v652_v60  ;;  %v679_v60 = vld [vmem:[#allocation3 + $0x360] sm:$0xff] }
 0x1be   :  { %570 = vmatpush1.bf16.msra.mxu0 %v505_v62  ;;  %v536_v62 = vld [vmem:[#allocation3 + $0x178] sm:$0xff] }
 0x1bf   :  { %716 = vmatpush1.bf16.msra.mxu1 %v651_v0  ;;  %571 = vmatprep.subr.bf16.mxu0 %v508_v3  ;;  %v682_v0 = vld [vmem:[#allocation3 + $0x378] sm:$0xff]  ;;  %v535_v3 = vld [vmem:[#allocation3 + $0x170] sm:$0xff] }
 0x1c0   :  { %717 = vmatprep.subr.bf16.mxu1 %v654_v7  ;;  %v681_v7 = vld [vmem:[#allocation3 + $0x370] sm:$0xff] }
 0x1c2   :  { %572 = vmatpush1.bf16.msra.mxu0 %v507_v8  ;;  %v538_v8 = vld [vmem:[#allocation3 + $0x188] sm:$0xff] }
 0x1c3   :  { %718 = vmatpush1.bf16.msra.mxu1 %v653_v9  ;;  %573 = vmatprep.subr.bf16.mxu0 %v510_v10  ;;  %v684_v9 = vld [vmem:[#allocation3 + $0x388] sm:$0xff]  ;;  %v537_v10 = vld [vmem:[#allocation3 + $0x180] sm:$0xff] }
 0x1c4   :  { %719 = vmatprep.subr.bf16.mxu1 %v656_v61  ;;  %v683_v61 = vld [vmem:[#allocation3 + $0x380] sm:$0xff] }
 0x1c6   :  { %574 = vmatpush1.bf16.msra.mxu0 %v509_v63  ;;  %v540_v63 = vld [vmem:[#allocation3 + $0x198] sm:$0xff] }
 0x1c7   :  { %720 = vmatpush1.bf16.msra.mxu1 %v655_v2  ;;  %575 = vmatprep.subr.bf16.mxu0 %v512_v5  ;;  %v686_v2 = vld [vmem:[#allocation3 + $0x398] sm:$0xff]  ;;  %v539_v5 = vld [vmem:[#allocation3 + $0x190] sm:$0xff] }
 0x1c8   :  { %721 = vmatprep.subr.bf16.mxu1 %v658_v11  ;;  %v685_v11 = vld [vmem:[#allocation3 + $0x390] sm:$0xff] }
 0x1ca   :  { %576 = vmatpush1.bf16.msra.mxu0 %v511_v6  ;;  %v542_v6 = vld [vmem:[#allocation3 + $0x1a8] sm:$0xff] }
 0x1cb   :  { %722 = vmatpush1.bf16.msra.mxu1 %v657_v1  ;;  %577 = vmatprep.subr.bf16.mxu0 %v514_v4  ;;  %v688_v1 = vld [vmem:[#allocation3 + $0x3a8] sm:$0xff]  ;;  %v541_v4 = vld [vmem:[#allocation3 + $0x1a0] sm:$0xff] }
 0x1cc   :  { %723 = vmatprep.subr.bf16.mxu1 %v660_v12  ;;  %v687_v12 = vld [vmem:[#allocation3 + $0x3a0] sm:$0xff] }
 0x1ce   :  { %578 = vmatpush1.bf16.msra.mxu0 %v513_v13  ;;  %v544_v13 = vld [vmem:[#allocation3 + $0x1b8] sm:$0xff] }
 0x1cf   :  { %724 = vmatpush1.bf16.msra.mxu1 %v659_v14  ;;  %579 = vmatprep.subr.bf16.mxu0 %v516_v15  ;;  %v690_v14 = vld [vmem:[#allocation3 + $0x3b8] sm:$0xff]  ;;  %v543_v15 = vld [vmem:[#allocation3 + $0x1b0] sm:$0xff] }
 0x1d0   :  { %725 = vmatprep.subr.bf16.mxu1 %v662_v16  ;;  %v689_v16 = vld [vmem:[#allocation3 + $0x3b0] sm:$0xff] }
 0x1d2   :  { %580 = vmatpush1.bf16.msra.mxu0 %v515_v17  ;;  %v546_v17 = vld [vmem:[#allocation3 + $0x1c8] sm:$0xff] }
 0x1d3   :  { %726 = vmatpush1.bf16.msra.mxu1 %v661_v19  ;;  %581 = vmatprep.subr.bf16.mxu0 %v518_v22  ;;  %v692_v19 = vld [vmem:[#allocation3 + $0x3c8] sm:$0xff]  ;;  %v545_v22 = vld [vmem:[#allocation3 + $0x1c0] sm:$0xff] }
 0x1d4   :  { %727 = vmatprep.subr.bf16.mxu1 %v664_v23  ;;  %v691_v23 = vld [vmem:[#allocation3 + $0x3c0] sm:$0xff] }
 0x1d6   :  { %582 = vmatpush1.bf16.msra.mxu0 %v517_v24  ;;  %v548_v24 = vld [vmem:[#allocation3 + $0x1d8] sm:$0xff] }
 0x1d7   :  { %728 = vmatpush1.bf16.msra.mxu1 %v663_v25  ;;  %583 = vmatprep.subr.bf16.mxu0 %v520_v26  ;;  %v694_v25 = vld [vmem:[#allocation3 + $0x3d8] sm:$0xff]  ;;  %v547_v26 = vld [vmem:[#allocation3 + $0x1d0] sm:$0xff] }
 0x1d8   :  { %729 = vmatprep.subr.bf16.mxu1 %v666_v27  ;;  %v693_v27 = vld [vmem:[#allocation3 + $0x3d0] sm:$0xff] }
 0x1da   :  { %584 = vmatpush1.bf16.msra.mxu0 %v519_v28  ;;  %v550_v28 = vld [vmem:[#allocation3 + $0x1e8] sm:$0xff] }
 0x1db   :  { %730 = vmatpush1.bf16.msra.mxu1 %v665_v29  ;;  %594 = vmatprep.subr.bf16.mxu0 %v522_v30  ;;  %v696_v29 = vld [vmem:[#allocation3 + $0x3e8] sm:$0xff]  ;;  %v549_v30 = vld [vmem:[#allocation3 + $0x1e0] sm:$0xff] }
 0x1dc   :  { %740 = vmatprep.subr.bf16.mxu1 %v668_v31  ;;  %v695_v31 = vld [vmem:[#allocation3 + $0x3e0] sm:$0xff] }
 0x1dd   :  { %586 = vmatmul.mubr.bf16.vlgmr.msra.gmra.mrb[4].mxu0 %v1723_v18 }
 0x1de   :  { %732 = vmatmul.mubr.bf16.vlgmr.msra.gmra.mrb[4].mxu1 %v1723_v18  ;;  %595 = vmatpush1.bf16.msra.mxu0 %v521_v32  ;;  %v674_v18 = vld [vmem:[#allocation3 + $0x338] sm:$0xff] }
 0x1df   :  { %741 = vmatpush1.bf16.msra.mxu1 %v667_v33  ;;  %596 = vmatprep.subr.bf16.mxu0 %v524_v34  ;;  %v552_v32 = vld [vmem:[#allocation3 + $0x1f8] sm:$0xff]  ;;  %v551_v34 = vld [vmem:[#allocation3 + $0x1f0] sm:$0xff] }
 0x1e0   :  { %742 = vmatprep.subr.bf16.mxu1 %v670_v36  ;;  %626 = vmatprep.mubr.bf16.mxu0 %v1727_v21  ;;  %v698_v33 = vld [vmem:[#allocation3 + $0x3f8] sm:$0xff]  ;;  %v697_v36 = vld [vmem:[#allocation3 + $0x3f0] sm:$0xff] }
 0x1e1   :  { %772 = vmatprep.mubr.bf16.mxu1 %v1727_v21  ;;  %v529_v21 = vld [vmem:[#allocation3 + $0x140] sm:$0xff] }
 0x1e2   :  { %597 = vmatpush1.bf16.msra.mxu0 %v523_v37  ;;  %v988_v37 = vld [vmem:[#allocation3 + $0x408] sm:$0xff] }
 0x1e3   :  { %743 = vmatpush1.bf16.msra.mxu1 %v669_v38  ;;  %598 = vmatprep.subr.bf16.mxu0 %v526_v39  ;;  %v987_v38 = vld [vmem:[#allocation3 + $0x400] sm:$0xff]  ;;  %v990_v39 = vld [vmem:[#allocation3 + $0x418] sm:$0xff] }
 0x1e4   :  { %744 = vmatprep.subr.bf16.mxu1 %v672_v40  ;;  %v989_v40 = vld [vmem:[#allocation3 + $0x410] sm:$0xff] }
 0x1e6   :  { %599 = vmatpush1.bf16.msra.mxu0 %v525_v41  ;;  %v992_v41 = vld [vmem:[#allocation3 + $0x428] sm:$0xff] }
 0x1e7   :  { %745 = vmatpush1.bf16.msra.mxu1 %v671_v42  ;;  %600 = vmatprep.subr.bf16.mxu0 %v528_v43  ;;  %v991_v42 = vld [vmem:[#allocation3 + $0x420] sm:$0xff]  ;;  %v994_v43 = vld [vmem:[#allocation3 + $0x438] sm:$0xff] }
 0x1e8   :  { %746 = vmatprep.subr.bf16.mxu1 %v674_v18  ;;  %v993_v18 = vld [vmem:[#allocation3 + $0x430] sm:$0xff] }
 0x1ea   :  { %601 = vmatpush1.bf16.msra.mxu0 %v527_v45  ;;  %v996_v45 = vld [vmem:[#allocation3 + $0x448] sm:$0xff] }
 0x1eb   :  { %747 = vmatpush1.bf16.msra.mxu1 %v673_v49  ;;  %602 = vmatprep.subr.bf16.mxu0 %v530_v50  ;;  %v995_v49 = vld [vmem:[#allocation3 + $0x440] sm:$0xff]  ;;  %v997_v50 = vld [vmem:[#allocation3 + $0x450] sm:$0xff] }
 0x1ec   :  { %748 = vmatprep.subr.bf16.mxu1 %v676_v51  ;;  %v1000_v51 = vld [vmem:[#allocation3 + $0x468] sm:$0xff] }
 0x1ee   :  { %603 = vmatpush1.bf16.msra.mxu0 %v529_v21  ;;  %v999_v21 = vld [vmem:[#allocation3 + $0x460] sm:$0xff] }
 0x1ef   :  { %749 = vmatpush1.bf16.msra.mxu1 %v675_v52  ;;  %604 = vmatprep.subr.bf16.mxu0 %v532_v53  ;;  %v1002_v52 = vld [vmem:[#allocation3 + $0x478] sm:$0xff]  ;;  %v1001_v53 = vld [vmem:[#allocation3 + $0x470] sm:$0xff] }
 0x1f0   :  { %750 = vmatprep.subr.bf16.mxu1 %v678_v54  ;;  %v1004_v54 = vld [vmem:[#allocation3 + $0x488] sm:$0xff] }
 0x1f2   :  { %605 = vmatpush1.bf16.msra.mxu0 %v531_v55  ;;  %v1003_v55 = vld [vmem:[#allocation3 + $0x480] sm:$0xff] }
 0x1f3   :  { %751 = vmatpush1.bf16.msra.mxu1 %v677_v56  ;;  %606 = vmatprep.subr.bf16.mxu0 %v534_v57  ;;  %v1006_v56 = vld [vmem:[#allocation3 + $0x498] sm:$0xff]  ;;  %v1005_v57 = vld [vmem:[#allocation3 + $0x490] sm:$0xff] }
 0x1f4   :  { %752 = vmatprep.subr.bf16.mxu1 %v680_v58  ;;  %v1008_v58 = vld [vmem:[#allocation3 + $0x4a8] sm:$0xff] }
 0x1f6   :  { %607 = vmatpush1.bf16.msra.mxu0 %v533_v59  ;;  %v1007_v59 = vld [vmem:[#allocation3 + $0x4a0] sm:$0xff] }
 0x1f7   :  { %753 = vmatpush1.bf16.msra.mxu1 %v679_v60  ;;  %608 = vmatprep.subr.bf16.mxu0 %v536_v62  ;;  %v1010_v60 = vld [vmem:[#allocation3 + $0x4b8] sm:$0xff]  ;;  %v1009_v62 = vld [vmem:[#allocation3 + $0x4b0] sm:$0xff] }
 0x1f8   :  { %754 = vmatprep.subr.bf16.mxu1 %v682_v0  ;;  %v1012_v0 = vld [vmem:[#allocation3 + $0x4c8] sm:$0xff] }
 0x1fa   :  { %609 = vmatpush1.bf16.msra.mxu0 %v535_v3  ;;  %v1011_v3 = vld [vmem:[#allocation3 + $0x4c0] sm:$0xff] }
 0x1fb   :  { %755 = vmatpush1.bf16.msra.mxu1 %v681_v7  ;;  %610 = vmatprep.subr.bf16.mxu0 %v538_v8  ;;  %v1014_v7 = vld [vmem:[#allocation3 + $0x4d8] sm:$0xff]  ;;  %v1013_v8 = vld [vmem:[#allocation3 + $0x4d0] sm:$0xff] }
 0x1fc   :  { %756 = vmatprep.subr.bf16.mxu1 %v684_v9  ;;  %v1016_v9 = vld [vmem:[#allocation3 + $0x4e8] sm:$0xff] }
 0x1fe   :  { %611 = vmatpush1.bf16.msra.mxu0 %v537_v10  ;;  %v1015_v10 = vld [vmem:[#allocation3 + $0x4e0] sm:$0xff] }
 0x1ff   :  { %757 = vmatpush1.bf16.msra.mxu1 %v683_v61  ;;  %612 = vmatprep.subr.bf16.mxu0 %v540_v63  ;;  %v1018_v61 = vld [vmem:[#allocation3 + $0x4f8] sm:$0xff]  ;;  %v1017_v63 = vld [vmem:[#allocation3 + $0x4f0] sm:$0xff] }
 0x200   :  { %758 = vmatprep.subr.bf16.mxu1 %v686_v2  ;;  %v1020_v2 = vld [vmem:[#allocation3 + $0x508] sm:$0xff] }
 0x202   :  { %613 = vmatpush1.bf16.msra.mxu0 %v539_v5 }
 0x203   :  { %759 = vmatpush1.bf16.msra.mxu1 %v685_v11  ;;  %614 = vmatprep.subr.bf16.mxu0 %v542_v6 }
 0x204   :  { %760 = vmatprep.subr.bf16.mxu1 %v688_v1 }
 0x206   :  { %615 = vmatpush1.bf16.msra.mxu0 %v541_v4 }
 0x207   :  { %761 = vmatpush1.bf16.msra.mxu1 %v687_v12  ;;  %616 = vmatprep.subr.bf16.mxu0 %v544_v13 }
 0x208   :  { %762 = vmatprep.subr.bf16.mxu1 %v690_v14 }
 0x20a   :  { %617 = vmatpush1.bf16.msra.mxu0 %v543_v15 }
 0x20b   :  { %763 = vmatpush1.bf16.msra.mxu1 %v689_v16  ;;  %618 = vmatprep.subr.bf16.mxu0 %v546_v17 }
 0x20c   :  { %764 = vmatprep.subr.bf16.mxu1 %v692_v19 }
 0x20e   :  { %619 = vmatpush1.bf16.msra.mxu0 %v545_v22 }
 0x20f   :  { %765 = vmatpush1.bf16.msra.mxu1 %v691_v23  ;;  %620 = vmatprep.subr.bf16.mxu0 %v548_v24 }
 0x210   :  { %766 = vmatprep.subr.bf16.mxu1 %v694_v25 }
 0x212   :  { %621 = vmatpush1.bf16.msra.mxu0 %v547_v26 }
 0x213   :  { %767 = vmatpush1.bf16.msra.mxu1 %v693_v27  ;;  %622 = vmatprep.subr.bf16.mxu0 %v550_v28 }
 0x214   :  { %768 = vmatprep.subr.bf16.mxu1 %v696_v29 }
 0x216   :  { %623 = vmatpush1.bf16.msra.mxu0 %v549_v30 }
 0x217   :  { %769 = vmatpush1.bf16.msra.mxu1 %v695_v31  ;;  %624 = vmatprep.subr.bf16.mxu0 %v552_v32 }
 0x218   :  { %770 = vmatprep.subr.bf16.mxu1 %v698_v33 }
 0x21a   :  { %625 = vmatpush1.bf16.msra.mxu0 %v551_v34 }
 0x21b   :  { %771 = vmatpush1.bf16.msra.mxu1 %v697_v36  ;;  %1051 = vmatprep.subr.bf16.mxu0 %v988_v37 }
 0x21d   :  { %627 = vmatmul.mubr.bf16.vlgmr.msra.gmra.mrb[4].mxu0 %v1725_v20 }
 0x21e   :  { %773 = vmatmul.mubr.bf16.vlgmr.msra.gmra.mrb[4].mxu1 %v1725_v20  ;;  %1052 = vmatpush1.bf16.msra.mxu0 %v987_v38  ;;  %v998_v20 = vld [vmem:[#allocation3 + $0x458] sm:$0xff] }
 0x21f   :  { %1053 = vmatprep.subr.bf16.mxu0 %v990_v39 }
 0x222   :  { %1054 = vmatpush1.bf16.msra.mxu0 %v989_v40 }
 0x223   :  { %1055 = vmatprep.subr.bf16.mxu0 %v992_v41 }
 0x226   :  { %1056 = vmatpush1.bf16.msra.mxu0 %v991_v42 }
 0x227   :  { %1057 = vmatprep.subr.bf16.mxu0 %v994_v43 }
 0x22a   :  { %1058 = vmatpush1.bf16.msra.mxu0 %v993_v18 }
 0x22b   :  { %1059 = vmatprep.subr.bf16.mxu0 %v996_v45 }
 0x22e   :  { %1060 = vmatpush1.bf16.msra.mxu0 %v995_v49 }
 0x22f   :  { %1061 = vmatprep.subr.bf16.mxu0 %v998_v20 }
 0x232   :  { %1062 = vmatpush1.bf16.msra.mxu0 %v997_v50 }
 0x233   :  { %1063 = vmatprep.subr.bf16.mxu0 %v1000_v51 }
 0x236   :  { %1064 = vmatpush1.bf16.msra.mxu0 %v999_v21 }
 0x237   :  { %1065 = vmatprep.subr.bf16.mxu0 %v1002_v52 }
 0x23a   :  { %1066 = vmatpush1.bf16.msra.mxu0 %v1001_v53 }
 0x23b   :  { %1067 = vmatprep.subr.bf16.mxu0 %v1004_v54 }
 0x23e   :  { %1068 = vmatpush1.bf16.msra.mxu0 %v1003_v55 }
 0x23f   :  { %1069 = vmatprep.subr.bf16.mxu0 %v1006_v56 }
 0x242   :  { %1070 = vmatpush1.bf16.msra.mxu0 %v1005_v57 }
 0x243   :  { %1071 = vmatprep.subr.bf16.mxu0 %v1008_v58 }
 0x246   :  { %1072 = vmatpush1.bf16.msra.mxu0 %v1007_v59 }
 0x247   :  { %1073 = vmatprep.subr.bf16.mxu0 %v1010_v60 }
 0x24a   :  { %1074 = vmatpush1.bf16.msra.mxu0 %v1009_v62 }
 0x24b   :  { %1075 = vmatprep.subr.bf16.mxu0 %v1012_v0 }
 0x24e   :  { %1076 = vmatpush1.bf16.msra.mxu0 %v1011_v3 }
 0x24f   :  { %1077 = vmatprep.subr.bf16.mxu0 %v1014_v7 }
 0x252   :  { %1078 = vmatpush1.bf16.msra.mxu0 %v1013_v8 }
 0x253   :  { %1079 = vmatprep.subr.bf16.mxu0 %v1016_v9 }
 0x256   :  { %1080 = vmatpush1.bf16.msra.mxu0 %v1015_v10 }
 0x257   :  { %1081 = vmatprep.subr.bf16.mxu0 %v1018_v61 }
 0x25a   :  { %1082 = vmatpush1.bf16.msra.mxu0 %v1017_v63 }
 0x25b   :  { %1092 = vmatprep.subr.bf16.mxu0 %v1020_v2 }
 0x2f0   :  { %v1735_v5 = vpop.f32.mrb[4].mxu0 }
 0x2f1   :  { %v1737_v11 = vpop.f32.mrb[4].mxu1  ;;  %v785_v6 = vrot.slane %v1735_v5, 4  ;;  %v809_v1 = vmul.f32 %v1735_v5, %v1735_v5  ;;  %v1745_v13 = vpop.f32.mrb[5].mxu0 }
 0x2f2   :  { %v797_v4 = vrot.slane %v1737_v11, 4  ;;  %v811_v12 = vmul.f32 %v1737_v11, %v1737_v11  ;;  %v1747_v14 = vpop.f32.mrb[5].mxu1  ;;  %v791_v15 = vrot.slane %v1745_v13, 4  ;;  %v810_v16 = vmul.f32 %v1745_v13, %v1745_v13  ;;  %v632_v22 = vpop.f32.mrb[6].mxu0 }
 0x2f3   :  { %v803_v17 = vrot.slane %v1747_v14, 4  ;;  %v812_v19 = vmul.f32 %v1747_v14, %v1747_v14  ;;  %v778_v23 = vpop.f32.mrb[6].mxu1  ;;  %v786_v24 = vadd.f32 %v785_v6, %v1735_v5  ;;  %v813_v25 = vrot.slane %v809_v1, 4  ;;  %v633_v28 = vpop.f32.mrb[7].mxu0 }
 0x2f4   :  { %v798_v26 = vadd.f32 %v797_v4, %v1737_v11  ;;  %v825_v27 = vrot.slane %v811_v12, 4  ;;  %v779_v29 = vpop.f32.mrb[7].mxu1  ;;  %v792_v30 = vadd.f32 %v791_v15, %v1745_v13  ;;  %v819_v31 = vrot.slane %v810_v16, 4 }
 0x2f5   :  { %v804_v32 = vadd.f32 %v803_v17, %v1747_v14  ;;  %v831_v33 = vrot.slane %v812_v19, 4  ;;  %v787_v34 = vrot.slane %v786_v24, 2  ;;  %v814_v36 = vadd.f32 %v813_v25, %v809_v1 }
 0x2f6   :  { %v799_v37 = vrot.slane %v798_v26, 2  ;;  %v826_v38 = vadd.f32 %v825_v27, %v811_v12  ;;  %v793_v39 = vrot.slane %v792_v30, 2  ;;  %v820_v40 = vadd.f32 %v819_v31, %v810_v16 }
 0x2f7   :  { %v805_v41 = vrot.slane %v804_v32, 2  ;;  %v832_v42 = vadd.f32 %v831_v33, %v812_v19  ;;  %v788_v43 = vadd.f32 %v787_v34, %v786_v24  ;;  %v815_v18 = vrot.slane %v814_v36, 2 }
 0x2f8   :  { %v800_v45 = vadd.f32 %v799_v37, %v798_v26  ;;  %v827_v49 = vrot.slane %v826_v38, 2  ;;  %v794_v20 = vadd.f32 %v793_v39, %v792_v30  ;;  %v821_v50 = vrot.slane %v820_v40, 2 }
 0x2f9   :  { %v806_v51 = vadd.f32 %v805_v41, %v804_v32  ;;  %v833_v21 = vrot.slane %v832_v42, 2  ;;  %v789_v52 = vrot.slane %v788_v43, 1  ;;  %v816_v53 = vadd.f32 %v815_v18, %v814_v36 }
 0x2fa   :  { %v801_v54 = vrot.slane %v800_v45, 1  ;;  %v828_v55 = vadd.f32 %v827_v49, %v826_v38  ;;  %v795_v56 = vrot.slane %v794_v20, 1  ;;  %v822_v57 = vadd.f32 %v821_v50, %v820_v40 }
 0x2fb   :  { %v807_v58 = vrot.slane %v806_v51, 1  ;;  %v834_v59 = vadd.f32 %v833_v21, %v832_v42  ;;  %v790_v60 = vadd.f32 %v789_v52, %v788_v43  ;;  %v817_v62 = vrot.slane %v816_v53, 1 }
 0x2fc   :  { %v802_v0 = vadd.f32 %v801_v54, %v800_v45  ;;  %v829_v3 = vrot.slane %v828_v55, 1  ;;  %v796_v7 = vadd.f32 %v795_v56, %v794_v20  ;;  %v823_v8 = vrot.slane %v822_v57, 1 }
 0x2fd   :  { %v808_v9 = vadd.f32 %v807_v58, %v806_v51  ;;  %v835_v10 = vrot.slane %v834_v59, 1  ;;  %v818_v61 = vadd.f32 %v817_v62, %v816_v53  ;;  %v837_v63 = vmul.f32 0.125, %v790_v60  ;;  %v782_v51 = vld [vmem:[#allocation7 + $0x2] ss:$8 sm:$0xf] }
 0x2fe   :  { %v830_v2 = vadd.f32 %v829_v3, %v828_v55  ;;  %v839_v6 = vmul.f32 0.125, %v802_v0  ;;  %v824_v1 = vadd.f32 %v823_v8, %v822_v57  ;;  %v838_v4 = vmul.f32 0.125, %v796_v7 }
 0x2ff   :  { %v836_v12 = vadd.f32 %v835_v10, %v834_v59  ;;  %v840_v15 = vmul.f32 0.125, %v808_v9  ;;  %v841_v16 = vmul.f32 0.125, %v818_v61  ;;  %v845_v17 = vmul.f32 %v837_v63, %v837_v63 }
 0x300   :  { %v843_v19 = vmul.f32 0.125, %v830_v2  ;;  %v847_v22 = vmul.f32 %v839_v6, %v839_v6  ;;  %v842_v23 = vmul.f32 0.125, %v824_v1  ;;  %v846_v24 = vmul.f32 %v838_v4, %v838_v4  ;;  %v784_v1 = vld [vmem:[#allocation7 + $0x3] ss:$8 sm:$0xf] }
 0x301   :  { %v844_v25 = vmul.f32 0.125, %v836_v12  ;;  %v848_v26 = vmul.f32 %v840_v15, %v840_v15  ;;  %v849_v27 = vsub.f32 %v841_v16, %v845_v17 }
 0x302   :  { %v851_v28 = vsub.f32 %v843_v19, %v847_v22  ;;  %v850_v29 = vsub.f32 %v842_v23, %v846_v24 }
 0x303   :  { %v852_v30 = vsub.f32 %v844_v25, %v848_v26  ;;  %v853_v31 = vmax.f32 %v849_v27, 0.0  ;;  %v1019_v25 = vld [vmem:[#allocation3 + $0x500] sm:$0xff]  ;;  %v1022_v27 = vld [vmem:[#allocation3 + $0x518] sm:$0xff] }
 0x304   :  { %v855_v32 = vmax.f32 %v851_v28, 0.0  ;;  %v854_v33 = vmax.f32 %v850_v29, 0.0  ;;  %v1023_v28 = vld [vmem:[#allocation3 + $0x520] sm:$0xff]  ;;  %v1026_v29 = vld [vmem:[#allocation3 + $0x538] sm:$0xff] }
 0x305   :  { %v856_v34 = vmax.f32 %v852_v30, 0.0  ;;  %v857_v36 = vadd.f32 1e-05, %v853_v31  ;;  %v1025_v30 = vld [vmem:[#allocation3 + $0x530] sm:$0xff]  ;;  %v1028_v31 = vld [vmem:[#allocation3 + $0x548] sm:$0xff] }
 0x306   :  { %v859_v37 = vadd.f32 1e-05, %v855_v32  ;;  %v858_v38 = vadd.f32 1e-05, %v854_v33  ;;  %v1027_v32 = vld [vmem:[#allocation3 + $0x540] sm:$0xff]  ;;  %v1030_v33 = vld [vmem:[#allocation3 + $0x558] sm:$0xff] }
 0x307   :  { %v860_v39 = vadd.f32 1e-05, %v856_v34  ;;  %1518 = vrsqrt.f32 %v857_v36  ;;  %v1029_v34 = vld [vmem:[#allocation3 + $0x550] sm:$0xff]  ;;  %v1032_v36 = vld [vmem:[#allocation3 + $0x568] sm:$0xff] }
 0x308   :  { %1520 = vrsqrt.f32 %v859_v37  ;;  %v1031_v37 = vld [vmem:[#allocation3 + $0x560] sm:$0xff] }
 0x309   :  { %1522 = vrsqrt.f32 %v858_v38  ;;  %v1034_v38 = vld [vmem:[#allocation3 + $0x578] sm:$0xff] }
 0x30a   :  { %1524 = vrsqrt.f32 %v860_v39  ;;  %v1033_v39 = vld [vmem:[#allocation3 + $0x570] sm:$0xff] }
 0x311   :  { %v1519_v40 = vpop.eup %1518 }
 0x312   :  { %v1521_v41 = vpop.eup %1520 }
 0x313   :  { %v1523_v42 = vpop.eup %1522 }
 0x314   :  { %v1525_v43 = vpop.eup %1524  ;;  %v869_v18 = vcombine.low %v1519_v40, %v1523_v42  ;;  %v1036_v40 = vld [vmem:[#allocation3 + $0x588] sm:$0xff]  ;;  %v1038_v42 = vld [vmem:[#allocation3 + $0x598] sm:$0xff] }
 0x315   :  { %v870_v45 = vcombine.low %v1521_v41, %v1525_v43  ;;  %v1035_v41 = vld [vmem:[#allocation3 + $0x580] sm:$0xff]  ;;  %v1037_v43 = vld [vmem:[#allocation3 + $0x590] sm:$0xff] }
 0x316   :  { %v877_v49 = vrot.slane %v869_v18, %v1695_v35  ;;  %v1040_v18 = vld [vmem:[#allocation3 + $0x5a8] sm:$0xff] }
 0x317   :  { %v884_v20 = vrot.slane %v870_v45, %v1695_v35  ;;  %v1039_v45 = vld [vmem:[#allocation3 + $0x5a0] sm:$0xff] }
 0x319   :  { %v885_v50 = vcombine.low %v877_v49, %v884_v20  ;;  %v1042_v49 = vld [vmem:[#allocation3 + $0x5b8] sm:$0xff]  ;;  %v1041_v20 = vld [vmem:[#allocation3 + $0x5b0] sm:$0xff] }
 0x31b   :  { %v892_v21 = vrot.slane %v885_v50, %v1695_v35  ;;  %v1044_v50 = vld [vmem:[#allocation3 + $0x5c8] sm:$0xff] }
 0x31d   :  { %v894_v52 = vmul.f32 %v892_v21, %v782_v51  ;;  %v1043_v51 = vld [vmem:[#allocation3 + $0x5c0] sm:$0xff]  ;;  %v1046_v21 = vld [vmem:[#allocation3 + $0x5d8] sm:$0xff] }
 0x31f   :  { %v907_v53 = vrot.slane %v894_v52, %v1704_v47  ;;  %v911_v54 = vrot.slane %v894_v52, %v1706_v48  ;;  %v899_v55 = vrot.slane %v894_v52, %v1699_v44  ;;  %v903_v56 = vrot.slane %v894_v52, %v1702_v46  ;;  %v1045_v52 = vld [vmem:[#allocation3 + $0x5d0] sm:$0xff] }
 0x321   :  { %v918_v57 = vmul.f32 %v907_v53, %v839_v6  ;;  %v919_v58 = vmul.f32 %v911_v54, %v840_v15  ;;  %v953_v59 = vmul.f32 %v911_v54, %v1747_v14  ;;  %v916_v60 = vmul.f32 %v899_v55, %v837_v63  ;;  %v1047_v54 = vld [vmem:[#allocation3 + $0x5e0] sm:$0xff] }
 0x322   :  { %v917_v62 = vmul.f32 %v903_v56, %v838_v4  ;;  %v951_v0 = vmul.f32 %v903_v56, %v1745_v13  ;;  %v950_v3 = vmul.f32 %v899_v55, %v1735_v5  ;;  %v952_v7 = vmul.f32 %v907_v53, %v1737_v11  ;;  %v1048_v53 = vld [vmem:[#allocation3 + $0x5e8] sm:$0xff]  ;;  %v1050_v55 = vld [vmem:[#allocation3 + $0x5f8] sm:$0xff]  ;;  %v1049_v56 = vld [vmem:[#allocation3 + $0x5f0] sm:$0xff] }
 0x323   :  { %v925_v8 = vcombine.low %v918_v57, %v919_v58 }
 0x324   :  { %v924_v9 = vcombine.low %v916_v60, %v917_v62  ;;  %v1247_v60 = vld [vmem:[#allocation3 + $0x600] sm:$0xff]  ;;  %v1250_v62 = vld [vmem:[#allocation3 + $0x618] sm:$0xff] }
 0x325   :  { %v939_v10 = vrot.slane %v925_v8, %v1695_v35  ;;  %v1254_v8 = vld [vmem:[#allocation3 + $0x638] sm:$0xff] }
 0x326   :  { %v932_v61 = vrot.slane %v924_v9, %v1695_v35  ;;  %v1253_v9 = vld [vmem:[#allocation3 + $0x630] sm:$0xff] }
 0x328   :  { %v940_v2 = vcombine.low %v932_v61, %v939_v10  ;;  %v1256_v10 = vld [vmem:[#allocation3 + $0x648] sm:$0xff]  ;;  %v1255_v61 = vld [vmem:[#allocation3 + $0x640] sm:$0xff] }
 0x32a   :  { %v947_v6 = vrot.slane %v940_v2, %v1695_v35  ;;  %v1258_v2 = vld [vmem:[#allocation3 + $0x658] sm:$0xff] }
 0x32c   :  { %v949_v12 = vsub.f32 %v784_v1, %v947_v6  ;;  %v1257_v1 = vld [vmem:[#allocation3 + $0x650] sm:$0xff]  ;;  %v1260_v6 = vld [vmem:[#allocation3 + $0x668] sm:$0xff] }
 0x32e   :  { %v962_v14 = vrot.slane %v949_v12, %v1702_v46  ;;  %v958_v63 = vrot.slane %v949_v12, %v1699_v44  ;;  %v970_v13 = vrot.slane %v949_v12, %v1706_v48  ;;  %v966_v5 = vrot.slane %v949_v12, %v1704_v47  ;;  %v1021_v48 = vld [vmem:[#allocation3 + $0x510] sm:$0xff]  ;;  %v1024_v47 = vld [vmem:[#allocation3 + $0x528] sm:$0xff]  ;;  %v1259_v12 = vld [vmem:[#allocation3 + $0x660] sm:$0xff] }
 0x330   :  { %v976_v11 = vadd.f32 %v962_v14, %v951_v0  ;;  %v975_v4 = vadd.f32 %v958_v63, %v950_v3  ;;  %v978_v15 = vadd.f32 %v970_v13, %v953_v59  ;;  %v1777_v16 = vadd.f32 %v966_v5, %v952_v7  ;;  %v1248_v59 = vld [vmem:[#allocation3 + $0x608] sm:$0xff]  ;;  %v1249_v0 = vld [vmem:[#allocation3 + $0x610] sm:$0xff]  ;;  %v1251_v7 = vld [vmem:[#allocation3 + $0x620] sm:$0xff] }
 0x331   :  { %1279 = vmatprep.subr.bf16.mxu1 %v1248_v59  ;;  %v1252_v3 = vld [vmem:[#allocation3 + $0x628] sm:$0xff]  ;;  %v1262_v14 = vld [vmem:[#allocation3 + $0x678] sm:$0xff]  ;;  %v1261_v63 = vld [vmem:[#allocation3 + $0x670] sm:$0xff] }
 0x332   :  { %v980_v17 = vmax.f32 %v976_v11, 0.0  ;;  %v979_v19 = vmax.f32 %v975_v4, 0.0  ;;  %v982_v22 = vmax.f32 %v978_v15, 0.0  ;;  %v981_v57 = vmax.f32 %v1777_v16, 0.0  ;;  %1280 = vmatpush1.bf16.msra.mxu1 %v1247_v60  ;;  %v1264_v13 = vld [vmem:[#allocation3 + $0x688] sm:$0xff]  ;;  %v1263_v5 = vld [vmem:[#allocation3 + $0x680] sm:$0xff] }
 0x333   :  { %1281 = vmatprep.subr.bf16.mxu1 %v1250_v62  ;;  %v1266_v11 = vld [vmem:[#allocation3 + $0x698] sm:$0xff]  ;;  %v1265_v4 = vld [vmem:[#allocation3 + $0x690] sm:$0xff]  ;;  %v1268_v15 = vld [vmem:[#allocation3 + $0x6a8] sm:$0xff] }
 0x334   :  { %v984_v23 = vpack.c.bf16 %v980_v17, %v980_v17  ;;  %v983_v24 = vpack.c.bf16 %v979_v19, %v979_v19  ;;  %v986_v26 = vpack.c.bf16 %v982_v22, %v982_v22  ;;  %v985_v58 = vpack.c.bf16 %v981_v57, %v981_v57  ;;  %v1267_v16 = vld [vmem:[#allocation3 + $0x6a0] sm:$0xff]  ;;  %v1270_v17 = vld [vmem:[#allocation3 + $0x6b8] sm:$0xff]  ;;  %v1269_v19 = vld [vmem:[#allocation3 + $0x6b0] sm:$0xff] }
 0x335   :  { %v1272_v22 = vld [vmem:[#allocation3 + $0x6c8] sm:$0xff] }
 0x336   :  { %1083 = vmatprep.mubr.bf16.mxu0 %v984_v23  ;;  %1282 = vmatpush1.bf16.msra.mxu1 %v1249_v0  ;;  %v1271_v23 = vld [vmem:[#allocation3 + $0x6c0] sm:$0xff] }
 0x337   :  { %1084 = vmatmul.mubr.bf16.vlgmr.msra.gmra.mrb[8].mxu0 %v983_v24  ;;  %1283 = vmatprep.subr.bf16.mxu1 %v1252_v3  ;;  %v1274_v24 = vld [vmem:[#allocation3 + $0x6d8] sm:$0xff] }
 0x338   :  { %1093 = vmatpush1.bf16.msra.mxu0 %v1019_v25  ;;  %1124 = vmatprep.mubr.bf16.mxu0 %v986_v26  ;;  %v1273_v25 = vld [vmem:[#allocation3 + $0x6d0] sm:$0xff]  ;;  %v1276_v26 = vld [vmem:[#allocation3 + $0x6e8] sm:$0xff] }
 0x339   :  { %1094 = vmatprep.subr.bf16.mxu0 %v1022_v27  ;;  %v1275_v27 = vld [vmem:[#allocation3 + $0x6e0] sm:$0xff] }
 0x33a   :  { %1284 = vmatpush1.bf16.msra.mxu1 %v1251_v7 }
 0x33b   :  { %1285 = vmatprep.subr.bf16.mxu1 %v1254_v8 }
 0x33c   :  { %1095 = vmatpush1.bf16.msra.mxu0 %v1021_v48  ;;  %v1278_v48 = vld [vmem:[#allocation3 + $0x6f8] sm:$0xff] }
 0x33d   :  { %1096 = vmatprep.subr.bf16.mxu0 %v1024_v47  ;;  %v1277_v47 = vld [vmem:[#allocation3 + $0x6f0] sm:$0xff] }
 0x33e   :  { %1286 = vmatpush1.bf16.msra.mxu1 %v1253_v9 }
 0x33f   :  { %1287 = vmatprep.subr.bf16.mxu1 %v1256_v10 }
 0x340   :  { %1097 = vmatpush1.bf16.msra.mxu0 %v1023_v28 }
 0x341   :  { %1098 = vmatprep.subr.bf16.mxu0 %v1026_v29 }
 0x342   :  { %1288 = vmatpush1.bf16.msra.mxu1 %v1255_v61 }
 0x343   :  { %1289 = vmatprep.subr.bf16.mxu1 %v1258_v2 }
 0x344   :  { %1099 = vmatpush1.bf16.msra.mxu0 %v1025_v30 }
 0x345   :  { %1100 = vmatprep.subr.bf16.mxu0 %v1028_v31 }
 0x346   :  { %1290 = vmatpush1.bf16.msra.mxu1 %v1257_v1 }
 0x347   :  { %1291 = vmatprep.subr.bf16.mxu1 %v1260_v6 }
 0x348   :  { %1101 = vmatpush1.bf16.msra.mxu0 %v1027_v32 }
 0x349   :  { %1102 = vmatprep.subr.bf16.mxu0 %v1030_v33 }
 0x34a   :  { %1292 = vmatpush1.bf16.msra.mxu1 %v1259_v12 }
 0x34b   :  { %1293 = vmatprep.subr.bf16.mxu1 %v1262_v14 }
 0x34c   :  { %1103 = vmatpush1.bf16.msra.mxu0 %v1029_v34 }
 0x34d   :  { %1104 = vmatprep.subr.bf16.mxu0 %v1032_v36 }
 0x34e   :  { %1294 = vmatpush1.bf16.msra.mxu1 %v1261_v63 }
 0x34f   :  { %1295 = vmatprep.subr.bf16.mxu1 %v1264_v13 }
 0x350   :  { %1105 = vmatpush1.bf16.msra.mxu0 %v1031_v37 }
 0x351   :  { %1106 = vmatprep.subr.bf16.mxu0 %v1034_v38 }
 0x352   :  { %1296 = vmatpush1.bf16.msra.mxu1 %v1263_v5  ;;  %v1134_v5 = vld [vmem:[#allocation7 + $0x4] ss:$8 sm:$0x3] }
 0x353   :  { %1297 = vmatprep.subr.bf16.mxu1 %v1266_v11 }
 0x354   :  { %1107 = vmatpush1.bf16.msra.mxu0 %v1033_v39 }
 0x355   :  { %1108 = vmatprep.subr.bf16.mxu0 %v1036_v40 }
 0x356   :  { %1298 = vmatpush1.bf16.msra.mxu1 %v1265_v4 }
 0x357   :  { %1299 = vmatprep.subr.bf16.mxu1 %v1268_v15 }
 0x358   :  { %1109 = vmatpush1.bf16.msra.mxu0 %v1035_v41 }
 0x359   :  { %1110 = vmatprep.subr.bf16.mxu0 %v1038_v42 }
 0x35a   :  { %1300 = vmatpush1.bf16.msra.mxu1 %v1267_v16 }
 0x35b   :  { %1301 = vmatprep.subr.bf16.mxu1 %v1270_v17 }
 0x35c   :  { %1111 = vmatpush1.bf16.msra.mxu0 %v1037_v43 }
 0x35d   :  { %1112 = vmatprep.subr.bf16.mxu0 %v1040_v18 }
 0x35e   :  { %1302 = vmatpush1.bf16.msra.mxu1 %v1269_v19 }
 0x35f   :  { %1303 = vmatprep.subr.bf16.mxu1 %v1272_v22 }
 0x360   :  { %1113 = vmatpush1.bf16.msra.mxu0 %v1039_v45 }
 0x361   :  { %1114 = vmatprep.subr.bf16.mxu0 %v1042_v49 }
 0x362   :  { %1304 = vmatpush1.bf16.msra.mxu1 %v1271_v23 }
 0x363   :  { %1305 = vmatprep.subr.bf16.mxu1 %v1274_v24 }
 0x364   :  { %1115 = vmatpush1.bf16.msra.mxu0 %v1041_v20 }
 0x365   :  { %1116 = vmatprep.subr.bf16.mxu0 %v1044_v50 }
 0x366   :  { %1306 = vmatpush1.bf16.msra.mxu1 %v1273_v25 }
 0x367   :  { %1307 = vmatprep.subr.bf16.mxu1 %v1276_v26  ;;  %v1136_v26 = vld [vmem:[#allocation7 + $0x5] ss:$8 sm:$0x3] }
 0x368   :  { %1117 = vmatpush1.bf16.msra.mxu0 %v1043_v51 }
 0x369   :  { %1118 = vmatprep.subr.bf16.mxu0 %v1046_v21 }
 0x36a   :  { %1308 = vmatpush1.bf16.msra.mxu1 %v1275_v27 }
 0x36b   :  { %1309 = vmatprep.subr.bf16.mxu1 %v1278_v48 }
 0x36c   :  { %1119 = vmatpush1.bf16.msra.mxu0 %v1045_v52 }
 0x36d   :  { %1120 = vmatprep.subr.bf16.mxu0 %v1048_v53 }
 0x36e   :  { %1310 = vmatpush1.bf16.msra.mxu1 %v1277_v47 }
 0x370   :  { %1121 = vmatpush1.bf16.msra.mxu0 %v1047_v54 }
 0x371   :  { %1122 = vmatprep.subr.bf16.mxu0 %v1050_v55 }
 0x374   :  { %1123 = vmatpush1.bf16.msra.mxu0 %v1049_v56 }
 0x377   :  { %1125 = vmatmul.mubr.bf16.vlgmr.msra.gmra.mrb[8].mxu0 %v985_v58 }
 0x44a   :  { %v1126_v28 = vpop.f32.mrb[8].mxu0 }
 0x44b   :  { %v1137_v29 = vrot.slane %v1126_v28, 4  ;;  %v1149_v30 = vmul.f32 %v1126_v28, %v1126_v28  ;;  %v1128_v31 = vpop.f32.mrb[9].mxu0 }
 0x44c   :  { %v1143_v32 = vrot.slane %v1128_v31, 4  ;;  %v1150_v33 = vmul.f32 %v1128_v31, %v1128_v31  ;;  %v1130_v34 = vpop.f32.mrb[10].mxu0 }
 0x44d   :  { %v1138_v36 = vadd.f32 %v1137_v29, %v1126_v28  ;;  %v1151_v37 = vrot.slane %v1149_v30, 4  ;;  %v1131_v38 = vpop.f32.mrb[11].mxu0 }
 0x44e   :  { %v1144_v39 = vadd.f32 %v1143_v32, %v1128_v31  ;;  %v1157_v40 = vrot.slane %v1150_v33, 4 }
 0x44f   :  { %v1139_v41 = vrot.slane %v1138_v36, 2  ;;  %v1152_v42 = vadd.f32 %v1151_v37, %v1149_v30 }
 0x450   :  { %v1145_v43 = vrot.slane %v1144_v39, 2  ;;  %v1158_v18 = vadd.f32 %v1157_v40, %v1150_v33 }
 0x451   :  { %v1140_v45 = vadd.f32 %v1139_v41, %v1138_v36  ;;  %v1153_v49 = vrot.slane %v1152_v42, 2 }
 0x452   :  { %v1146_v20 = vadd.f32 %v1145_v43, %v1144_v39  ;;  %v1159_v50 = vrot.slane %v1158_v18, 2 }
 0x453   :  { %v1141_v51 = vrot.slane %v1140_v45, 1  ;;  %v1154_v21 = vadd.f32 %v1153_v49, %v1152_v42 }
 0x454   :  { %v1147_v52 = vrot.slane %v1146_v20, 1  ;;  %v1160_v53 = vadd.f32 %v1159_v50, %v1158_v18 }
 0x455   :  { %v1142_v54 = vadd.f32 %v1141_v51, %v1140_v45  ;;  %v1155_v55 = vrot.slane %v1154_v21, 1 }
 0x456   :  { %v1148_v56 = vadd.f32 %v1147_v52, %v1146_v20  ;;  %v1161_v57 = vrot.slane %v1160_v53, 1 }
 0x457   :  { %v1156_v58 = vadd.f32 %v1155_v55, %v1154_v21  ;;  %v1163_v59 = vmul.f32 0.125, %v1142_v54 }
 0x458   :  { %v1162_v60 = vadd.f32 %v1161_v57, %v1160_v53  ;;  %v1164_v62 = vmul.f32 0.125, %v1148_v56 }
 0x459   :  { %v1165_v0 = vmul.f32 0.125, %v1156_v58  ;;  %v1167_v3 = vmul.f32 %v1163_v59, %v1163_v59 }
 0x45a   :  { %v1166_v7 = vmul.f32 0.125, %v1162_v60  ;;  %v1168_v8 = vmul.f32 %v1164_v62, %v1164_v62 }
 0x45b   :  { %v1169_v9 = vsub.f32 %v1165_v0, %v1167_v3 }
 0x45c   :  { %v1170_v10 = vsub.f32 %v1166_v7, %v1168_v8 }
 0x45d   :  { %v1171_v61 = vmax.f32 %v1169_v9, 0.0 }
 0x45e   :  { %v1172_v2 = vmax.f32 %v1170_v10, 0.0 }
 0x45f   :  { %v1173_v1 = vadd.f32 1e-05, %v1171_v61 }
 0x460   :  { %v1174_v6 = vadd.f32 1e-05, %v1172_v2 }
 0x461   :  { %1526 = vrsqrt.f32 %v1173_v1 }
 0x462   :  { %1528 = vrsqrt.f32 %v1174_v6 }
 0x46b   :  { %v1527_v12 = vpop.eup %1526 }
 0x46c   :  { %v1529_v14 = vpop.eup %1528 }
 0x46d   :  { %v1179_v63 = vcombine.low %v1527_v12, %v1529_v14 }
 0x46f   :  { %v1186_v13 = vrot.slane %v1179_v63, %v1695_v35 }
 0x471   :  { %v1193_v11 = vrot.slane %v1186_v13, %v1695_v35 }
 0x473   :  { %v1195_v4 = vmul.f32 %v1193_v11, %v1134_v5 }
 0x475   :  { %v1200_v15 = vrot.slane %v1195_v4, %v1699_v44  ;;  %v1204_v16 = vrot.slane %v1195_v4, %v1702_v46 }
 0x477   :  { %v1207_v17 = vmul.f32 %v1200_v15, %v1163_v59  ;;  %v1208_v19 = vmul.f32 %v1204_v16, %v1164_v62  ;;  %v1229_v22 = vmul.f32 %v1204_v16, %v1128_v31  ;;  %v1228_v23 = vmul.f32 %v1200_v15, %v1126_v28 }
 0x479   :  { %v1211_v24 = vcombine.low %v1207_v17, %v1208_v19 }
 0x47b   :  { %v1218_v25 = vrot.slane %v1211_v24, %v1695_v35 }
 0x47d   :  { %v1225_v27 = vrot.slane %v1218_v25, %v1695_v35 }
 0x47f   :  { %v1227_v48 = vsub.f32 %v1136_v26, %v1225_v27 }
 0x481   :  { %v1238_v47 = vrot.slane %v1227_v48, %v1702_v46  ;;  %v1234_v29 = vrot.slane %v1227_v48, %v1699_v44 }
 0x483   :  { %v1242_v30 = vadd.f32 %v1238_v47, %v1229_v22  ;;  %v1241_v32 = vadd.f32 %v1234_v29, %v1228_v23  ;;  %v1321_v22 = vld [vmem:[#allocation7 + $0x6] ss:$8 sm:$0x3] }
 0x485   :  { %v1244_v33 = vmax.f32 %v1242_v30, 0.0  ;;  %v1243_v34 = vmax.f32 %v1241_v32, 0.0 }
 0x487   :  { %v1246_v36 = vpack.c.bf16 %v1244_v33, %v1244_v33  ;;  %v1245_v37 = vpack.c.bf16 %v1243_v34, %v1243_v34  ;;  %v1323_v33 = vld [vmem:[#allocation7 + $0x7] ss:$8 sm:$0x3] }
 0x489   :  { %1311 = vmatprep.mubr.bf16.mxu1 %v1246_v36 }
 0x48a   :  { %1312 = vmatmul.mubr.bf16.vlgmr.msra.gmra.mrb[8].mxu1 %v1245_v37  ;;  %v1433_v37 = vld [vmem:[#allocation7 + $0x20] ss:$8 sm:$0x3] }
 0x55d   :  { %v1313_v28 = vpop.f32.mrb[8].mxu1 }
 0x55e   :  { %v1324_v31 = vrot.slane %v1313_v28, 4  ;;  %v1336_v38 = vmul.f32 %v1313_v28, %v1313_v28  ;;  %v1315_v39 = vpop.f32.mrb[9].mxu1 }
 0x55f   :  { %v1330_v40 = vrot.slane %v1315_v39, 4  ;;  %v1337_v41 = vmul.f32 %v1315_v39, %v1315_v39  ;;  %v1317_v42 = vpop.f32.mrb[10].mxu1 }
 0x560   :  { %v1325_v43 = vadd.f32 %v1324_v31, %v1313_v28  ;;  %v1338_v18 = vrot.slane %v1336_v38, 4  ;;  %v1318_v45 = vpop.f32.mrb[11].mxu1  ;;  %v1439_v42 = vrot.slane %v1433_v37, %v1699_v44 }
 0x561   :  { %v1331_v49 = vadd.f32 %v1330_v40, %v1315_v39  ;;  %v1344_v20 = vrot.slane %v1337_v41, 4 }
 0x562   :  { %v1326_v50 = vrot.slane %v1325_v43, 2  ;;  %v1339_v51 = vadd.f32 %v1338_v18, %v1336_v38 }
 0x563   :  { %v1332_v21 = vrot.slane %v1331_v49, 2  ;;  %v1345_v52 = vadd.f32 %v1344_v20, %v1337_v41  ;;  %v1434_v20 = vld [vmem:[#allocation7 + $0x21] ss:$0 sm:$0xff] }
 0x564   :  { %v1327_v53 = vadd.f32 %v1326_v50, %v1325_v43  ;;  %v1340_v54 = vrot.slane %v1339_v51, 2 }
 0x565   :  { %v1333_v55 = vadd.f32 %v1332_v21, %v1331_v49  ;;  %v1346_v56 = vrot.slane %v1345_v52, 2 }
 0x566   :  { %v1328_v57 = vrot.slane %v1327_v53, 1  ;;  %v1341_v58 = vadd.f32 %v1340_v54, %v1339_v51 }
 0x567   :  { %v1334_v59 = vrot.slane %v1333_v55, 1  ;;  %v1347_v60 = vadd.f32 %v1346_v56, %v1345_v52 }
 0x568   :  { %v1329_v62 = vadd.f32 %v1328_v57, %v1327_v53  ;;  %v1342_v0 = vrot.slane %v1341_v58, 1 }
 0x569   :  { %v1335_v3 = vadd.f32 %v1334_v59, %v1333_v55  ;;  %v1348_v7 = vrot.slane %v1347_v60, 1 }
 0x56a   :  { %v1343_v8 = vadd.f32 %v1342_v0, %v1341_v58  ;;  %v1350_v9 = vmul.f32 0.125, %v1329_v62 }
 0x56b   :  { %v1349_v10 = vadd.f32 %v1348_v7, %v1347_v60  ;;  %v1351_v61 = vmul.f32 0.125, %v1335_v3 }
 0x56c   :  { %v1352_v2 = vmul.f32 0.125, %v1343_v8  ;;  %v1354_v1 = vmul.f32 %v1350_v9, %v1350_v9 }
 0x56d   :  { %v1353_v6 = vmul.f32 0.125, %v1349_v10  ;;  %v1355_v12 = vmul.f32 %v1351_v61, %v1351_v61 }
 0x56e   :  { %v1356_v14 = vsub.f32 %v1352_v2, %v1354_v1 }
 0x56f   :  { %v1357_v63 = vsub.f32 %v1353_v6, %v1355_v12 }
 0x570   :  { %v1358_v13 = vmax.f32 %v1356_v14, 0.0 }
 0x571   :  { %v1359_v5 = vmax.f32 %v1357_v63, 0.0 }
 0x572   :  { %v1360_v11 = vadd.f32 1e-05, %v1358_v13 }
 0x573   :  { %v1361_v4 = vadd.f32 1e-05, %v1359_v5 }
 0x574   :  { %1530 = vrsqrt.f32 %v1360_v11 }
 0x575   :  { %1532 = vrsqrt.f32 %v1361_v4 }
 0x57e   :  { %v1531_v15 = vpop.eup %1530 }
 0x57f   :  { %v1533_v16 = vpop.eup %1532 }
 0x580   :  { %v1366_v17 = vcombine.low %v1531_v15, %v1533_v16 }
 0x582   :  { %v1373_v19 = vrot.slane %v1366_v17, %v1695_v35 }
 0x584   :  { %v1380_v23 = vrot.slane %v1373_v19, %v1695_v35 }
 0x586   :  { %v1382_v24 = vmul.f32 %v1380_v23, %v1321_v22 }
 0x588   :  { %v1391_v25 = vrot.slane %v1382_v24, %v1702_v46  ;;  %v1387_v26 = vrot.slane %v1382_v24, %v1699_v44 }
 0x58a   :  { %v1395_v27 = vmul.f32 %v1391_v25, %v1351_v61  ;;  %v1416_v48 = vmul.f32 %v1391_v25, %v1315_v39  ;;  %v1394_v47 = vmul.f32 %v1387_v26, %v1350_v9  ;;  %v1415_v29 = vmul.f32 %v1387_v26, %v1313_v28 }
 0x58b   :  { %v1443_v39 = vrot.slane %v1433_v37, %v1702_v46 }
 0x58c   :  { %v1398_v30 = vcombine.low %v1394_v47, %v1395_v27 }
 0x58e   :  { %v1405_v32 = vrot.slane %v1398_v30, %v1695_v35 }
 0x590   :  { %v1412_v34 = vrot.slane %v1405_v32, %v1695_v35 }
 0x592   :  { %v1414_v36 = vsub.f32 %v1323_v33, %v1412_v34 }
 0x594   :  { %v1421_v31 = vrot.slane %v1414_v36, %v1699_v44  ;;  %v1425_v38 = vrot.slane %v1414_v36, %v1702_v46 }
 0x596   :  { %v1428_v40 = vadd.f32 %v1421_v31, %v1415_v29  ;;  %v1429_v41 = vadd.f32 %v1425_v38, %v1416_v48 }
 0x598   :  { %v1430_v43 = vmax.f32 %v1428_v40, 0.0  ;;  %v1431_v28 = vmax.f32 %v1429_v41, 0.0 }
 0x59a   :  { %v1446_v18 = vmul.f32 %v1439_v42, %v1430_v43  ;;  %v1447_v45 = vmul.f32 %v1443_v39, %v1431_v28 }
 0x59c   :  { %v1448_v49 = vadd.f32 %v1447_v45, %v1446_v18 }
 0x59e   :  { %1449 = vadd.xlane.f32.xlu0 %v1448_v49 }
 0x62b   :  { %v1450_v35 = vpop.xlane.xlu0 %1449 }
 0x62c   :  { %v1451_v50 = vadd.f32 %v1450_v35, %v1434_v20 }
 0x62e   :  { %1453 = vst.msk [vmem:[%s1805_s4] sm:$0xff] %vm1452_vm0, %v1451_v50 }
 0x62f   :  { %1458 = vsyncpa [#allocation6], 1 }
 0x630   :  { %1459 = vsyncpa [#allocation8], 1 }
 0x631   :  { %1460 = vsyncmov [#allocation4] }
 0x634   :  { %s1461_s7 = vpop.sfrf %1460 }
 0x635   :  { %p1479_p2 = scmp.ne.s32.totalorder %s1461_s7, 0 }
 0x637   :  { %1465 = shalt.err (%p1479_p2)  }
 0x638   :  { %1467 = vsyncmov [#allocation4 + $0x1] }
 0x63b   :  { %s1468_s8 = vpop.sfrf %1467 }
 0x63c   :  { %p1480_p3 = scmp.ne.s32.totalorder %s1468_s8, 0 }
 0x63e   :  { %1472 = shalt.err (%p1480_p3)  }

</bundles_post_ra>
